<compile_context>
chip_gen: v6e
topology: v6e:2x2x1
jax: 0.10.0
libtpu: 0.0.40
codegen_flags: <defaults>
</compile_context>

<pallas_src>
import numpy as np
import jax
import jax.numpy as jnp
from jax.experimental import pallas as pl
from jax.experimental.pallas import tpu as pltpu

# ---------------- model hyper-parameters (small but consistent with the module) --------
IMG_DIM   = 64                          # spatial_size = ceil(64 / 32) = 2
NUM_SEQ   = 8
SEQ_LEN   = 5
PRED_STEP = 3
LATENT    = 8
FEATURE   = 32                          # stand-in param['feature_size'] (= input_size = state_size)
C_IN      = 3                           # channels of the stand-in pooled backbone input
SPATIAL   = int(np.ceil(IMG_DIM / 32))  # 2
BATCH     = 2
ROWS      = BATCH * SPATIAL * SPATIAL   # pixels per timestep (rows of every tile) = 8

# ---------------- packed weight-slab layout (rows) --------------------------------------
_ROW_WH    = 0                          # (F, 144)  [prior_mu|prior_lv | whr|whu|whc | gen_wh]
_ROW_WXW   = FEATURE                    # (F,  96)  x -> [r|u|c]
_ROW_WXZ   = 2 * FEATURE                # (L, 128)  z -> [r|u|c|gen_z]
_ROW_FEATW = 2 * FEATURE + LATENT       # (C_IN, 32) backbone 1x1 channel projection
_ROW_BH    = _ROW_FEATW + C_IN          # (1, 144)  [prior_b | br|bu|bc | gen_b]
_ROW_BX    = _ROW_BH + 1                # (1,  96)
_ROW_FB    = _ROW_BX + 1                # (1,  32)
_WSLAB_ROWS = _ROW_FB + 1               # 78
_WSLAB_COLS = 2 * LATENT + 4 * FEATURE  # 144


# ---------------- single fused Pallas kernel --------------------------------------------
def _fused_vrnn_kernel(xrows_ref, eps_ref, wslab_ref, score_ref):
    F, L, N, P, R = FEATURE, LATENT, NUM_SEQ, PRED_STEP, ROWS
    B, S2 = BATCH, SPATIAL * SPATIAL
    NSEEN = N - P
    dot = lambda a, b: jnp.dot(a, b, preferred_element_type=jnp.float32)

    # ---- unpack the weight slab (static slices, done once) ----
    wh_all = wslab_ref[_ROW_WH:_ROW_WH + F, :]                     # (F, 2L+4F) = (32,144)
    wxw    = wslab_ref[_ROW_WXW:_ROW_WXW + F, 0:3 * F]             # (32, 96)
    wxz    = wslab_ref[_ROW_WXZ:_ROW_WXZ + L, 0:4 * F]             # (8, 128)
    featw  = wslab_ref[_ROW_FEATW:_ROW_FEATW + C_IN, 0:F]          # (3, 32)
    featb  = wslab_ref[_ROW_FB:_ROW_FB + 1, 0:F]                   # (1, 32)
    bx_row = wslab_ref[_ROW_BX:_ROW_BX + 1, 0:3 * F]               # (1, 96)
    bh_row = wslab_ref[_ROW_BH:_ROW_BH + 1, :]                     # (1, 144)

    # ---- hoisted bias broadcasts (unrolled loops would otherwise re-emit them) ----
    bh_b  = jnp.broadcast_to(bh_row, (R, 2 * L + 4 * F))           # (8, 144)
    bx_b  = jnp.broadcast_to(bx_row, (R, 3 * F))                   # (8, 96)
    bx40  = jnp.broadcast_to(bx_row, (NSEEN * R, 3 * F))           # (40, 96)

    # ---- 1x1 feature projection for ALL timesteps at once (fused backbone head) ----
    # xrows row order: rows [0 : NSEEN*R) = seen timesteps in (t, b, s) order,
    #                  rows [NSEEN*R : )  = future timesteps already in (b, p, s) order.
    w_all = dot(xrows_ref[...], featw) + featb                     # (N*R, F)
    w_relu_seen = jnp.maximum(w_all[:NSEEN * R, :], 0.0)           # (40, F)
    truths = w_all[NSEEN * R:, :]                                  # (24, F) pre-ReLU, (b,p,s) order

    # ---- hoisted x-side gate matmul for all seen steps: one (40,32)@(32,96) push ----
    gx_seen = dot(w_relu_seen, wxw) + bx40                         # (40, 3F)

    eps = eps_ref[...]                                             # (N*R, L)

    def gate_blend(gxz, gh, h):
        # gxz: (R, >=3F) packed [r|u|c];  gh: (R, 144) packed [mu|lv|r|u|c|gen_h]
        r = jax.nn.sigmoid(gxz[:, 0 * F:1 * F] + gh[:, 2 * L + 0 * F:2 * L + 1 * F])
        u = jax.nn.sigmoid(gxz[:, 1 * F:2 * F] + gh[:, 2 * L + 1 * F:2 * L + 2 * F])
        c = jnp.tanh(gxz[:, 2 * F:3 * F] + r * gh[:, 2 * L + 2 * F:2 * L + 3 * F])
        # TODO(synk): My_VRNN_Conv_GRU source not provided; assuming h' = u*h + (1-u)*c.
        return u * h + (1.0 - u) * c

    # ---- aggregate the "seen" part (t = 0 .. N-P-1) ----
    # t = 0: h_last = None -> h = 0, so hall = bias row only (matmul skipped).
    # TODO(synk): prior_first source not provided; assume standard-normal prior (z = eps).
    z = eps[0:R, :]
    gz = dot(z, wxz)                                               # (8, 128)
    h = gate_blend(gx_seen[0:R, :] + gz[:, 0:3 * F], bh_b,
                   jnp.zeros((R, F), jnp.float32))
    for t in range(1, NSEEN):
        hall = dot(h, wh_all) + bh_b                               # (8, 144): prior + gates + gen_h
        mu, logvar = hall[:, 0:L], hall[:, L:2 * L]
        z = mu + jnp.exp(0.5 * logvar) * eps[t * R:(t + 1) * R, :]
        gz = dot(z, wxz)
        h = gate_blend(gx_seen[t * R:(t + 1) * R, :] + gz[:, 0:3 * F], hall, h)
        # rnn dropout (p = 0.1) is identity in eval mode (default forward).

    # ---- predict the future via the prior (do_encode=False) ----
    preds = []
    for t in range(P):
        hall = dot(h, wh_all) + bh_b
        mu, logvar = hall[:, 0:L], hall[:, L:2 * L]
        z = mu + jnp.exp(0.5 * logvar) * eps[(NSEEN + t) * R:(NSEEN + t + 1) * R, :]
        gz = dot(z, wxz)                                           # GRU z-gates AND gen_z in one push
        # TODO(synk): exact output nonlinearity of generation() not provided; linear 1x1 conv.
        w_hat = hall[:, 2 * L + 3 * F:2 * L + 4 * F] + gz[:, 3 * F:4 * F]   # gen_h(+gen_b) + gen_z
        gx = dot(w_hat, wxw) + bx_b
        h = gate_blend(gx + gz[:, 0:3 * F], hall, h)
        preds.append(w_hat)

    # ---- contrastive score, in-kernel, rows/cols already in reference (b, p, s) order ----
    preds_bps = jnp.concatenate(
        [preds[p][b * S2:(b + 1) * S2, :] for b in range(B) for p in range(P)],
        axis=0)                                                    # (B*P*S2, F)
    score_ref[...] = jax.lax.dot_general(
        preds_bps, truths,
        dimension_numbers=(((1,), (1,)), ((), ())),                # preds @ truths.T on MXU
        preferred_element_type=jnp.float32)


def fused_vrnn_pallas(xrows, eps, wslab):
    M = BATCH * PRED_STEP * SPATIAL * SPATIAL
    vmem = lambda: pl.BlockSpec(memory_space=pltpu.MemorySpace.VMEM)
    # No grid: single invocation, whole arrays resident in VMEM (no useless double-buffering).
    return pl.pallas_call(
        _fused_vrnn_kernel,
        out_shape=jax.ShapeDtypeStruct((M, M), jnp.float32),
        in_specs=[vmem(), vmem(), vmem()],
        out_specs=vmem(),
    )(xrows, eps, wslab)


# ---------------- parameters (deterministic, in-script; packed into ONE slab) -----------
def init_params(key):
    F, L = FEATURE, LATENT
    ks = jax.random.split(key, 9)

    def w(k, shape, scale=0.1):
        # TODO(synk): reference uses orthogonal init; gaussian stand-in.
        return scale * jax.random.normal(k, shape, dtype=jnp.float32)

    # ConvGRU 1x1 convs (input = [w || z]) and prior / generation 1x1 convs.
    wxr, wxu, wxc = w(ks[0], (F + L, F)), w(ks[1], (F + L, F)), w(ks[2], (F + L, F))
    whr, whu, whc = w(ks[3], (F, F)), w(ks[4], (F, F)), w(ks[5], (F, F))
    prior_w = w(ks[6], (F, 2 * L))      # state -> (mu, logvar)
    gen_w = w(ks[7], (F + L, F))        # [state || latent] -> input
    feat_w = w(ks[8], (C_IN, F))        # stand-in backbone channel projection (3 -> F)

    # lane-dense packs: mu|logvar first (latency-critical for the next z-matmul),
    # gen_wh / gen_wz folded in so prediction steps need only 3 MXU pushes.
    wh_all = jnp.concatenate([prior_w, whr, whu, whc, gen_w[:F]], axis=1)      # (F, 144)
    wxw = jnp.concatenate([wxr[:F], wxu[:F], wxc[:F]], axis=1)                 # (F, 96)
    wxz = jnp.concatenate([wxr[F:], wxu[F:], wxc[F:], gen_w[F:]], axis=1)      # (L, 128)

    bh_all = jnp.zeros((1, 2 * L + 4 * F), jnp.float32)   # [prior_b | br|bu|bc | gen_b]
    bx = jnp.zeros((1, 3 * F), jnp.float32)
    feat_b = jnp.zeros((1, F), jnp.float32)

    def padw(a):
        return jnp.pad(a, ((0, 0), (0, _WSLAB_COLS - a.shape[1])))

    wslab = jnp.concatenate([
        wh_all,          # rows  0:32
        padw(wxw),       # rows 32:64
        padw(wxz),       # rows 64:72
        padw(feat_w),    # rows 72:75
        bh_all,          # row  75
        padw(bx),        # row  76
        padw(feat_b),    # row  77
    ], axis=0)           # (78, 144)
    assert wslab.shape == (_WSLAB_ROWS, _WSLAB_COLS)
    # NOTE: the module's inference (posterior) conv is unused when do_encode=False.
    return {'wslab': wslab}


# ---------------- mask (DPC_VRNN.compute_mask, called with N = pred_step) ----------------
def compute_mask(B, N):
    P, S2 = PRED_STEP, SPATIAL * SPATIAL
    b1 = np.arange(B).reshape(B, 1, 1, 1, 1, 1)
    pp = np.arange(P).reshape(1, P, 1, 1, 1, 1)
    s1 = np.arange(S2).reshape(1, 1, S2, 1, 1, 1)
    b2 = np.arange(B).reshape(1, 1, 1, B, 1, 1)
    nn = np.arange(N).reshape(1, 1, 1, 1, N, 1)
    s2 = np.arange(S2).reshape(1, 1, 1, 1, 1, S2)
    mask = np.zeros((B, P, S2, B, N, S2), dtype=np.int8)
    same_b = (b1 == b2)
    same_s = same_b & (s1 == s2)
    positive = same_s & (nn == (N - P) + pp)
    mask = np.where(same_b, -3, mask)
    mask = np.where(same_s, -1, mask)
    mask = np.where(positive, 1, mask)
    return jnp.asarray(mask.astype(np.int8))


# ---------------- DPC_VRNN forward ------------------------------------------------------
def dpc_vrnn_forward(params, x, key):
    B, N, C, SL, H, W = x.shape
    S, P = SPATIAL, PRED_STEP
    R = B * S * S

    # TODO(synk): select_resnet('resnet50') definition is not part of the given module;
    #             stand-in backbone = 32x spatial avg-pool + temporal avg-pool (the
    #             last_duration pool collapses into the same mean); the 1x1 channel
    #             projection to FEATURE channels runs inside the fused Pallas kernel.
    pooled = x.reshape(B, N, C, SL, S, H // S, S, W // S).mean(axis=(3, 5, 7))   # (B,N,C,S,S)
    # Seen timesteps in (t, b, s1, s2) order (one R-row block per step),
    # future timesteps already in (b, p, s1, s2) order = the reference score ordering.
    seen = pooled[:, :N - P].transpose(1, 0, 3, 4, 2).reshape((N - P) * R, C)
    future = pooled[:, N - P:].transpose(0, 1, 3, 4, 2).reshape(P * R, C)
    xrows = jnp.concatenate([seen, future], axis=0)                              # (N*R, C)

    # pre-sampled standard-normal noise, one (R, L) slab per timestep
    eps = jax.random.normal(key, (N * R, LATENT), dtype=jnp.float32)

    # one pallas_call runs backbone head + full N-step recurrence + score matmul;
    # score rows/cols come out directly in the reference (b, p, s1, s2) ordering.
    score = fused_vrnn_pallas(xrows, eps, params['wslab'])

    mask = compute_mask(B, P)
    return score, mask


# ---------------- main ------------------------------------------------------------------
if __name__ == "__main__":
    key = jax.random.PRNGKey(0)
    k_x, k_p, k_s = jax.random.split(key, 3)

    # x: (B, N, C, SL, H, W)
    x = jax.random.normal(k_x, (BATCH, NUM_SEQ, 3, SEQ_LEN, IMG_DIM, IMG_DIM), dtype=jnp.float32)
    params = init_params(k_p)

    score, mask = jax.jit(dpc_vrnn_forward)(params, x, k_s)
    jax.block_until_ready((score, mask))

    M = BATCH * PRED_STEP * SPATIAL * SPATIAL
    assert score.shape == (M, M) and score.dtype == jnp.float32
    assert mask.shape == (BATCH, PRED_STEP, SPATIAL**2, BATCH, PRED_STEP, SPATIAL**2)
    assert mask.dtype == jnp.int8
    print("KERNEL_OK")
</pallas_src>

<mosaic_0001>
module attributes {stable_mosaic.version = 11 : i64} {
  func.func @_fused_vrnn_kernel(%arg0: memref<64x3xf32, #tpu.memory_space<vmem>>, %arg1: memref<64x8xf32, #tpu.memory_space<vmem>>, %arg2: memref<78x144xf32, #tpu.memory_space<vmem>>, %arg3: memref<24x24xf32, #tpu.memory_space<vmem>>) attributes {dimension_semantics = [], scalar_prefetch = 0 : i64, scratch_operands = 0 : i64, tpu.core_type = #tpu.core_type<tc>} {
    %c0 = arith.constant 0 : index
    %c0_0 = arith.constant 0 : index
    %0 = vector.load %arg2[%c0, %c0_0] : memref<78x144xf32, #tpu.memory_space<vmem>>, vector<32x144xf32>
    %c32 = arith.constant 32 : index
    %c0_1 = arith.constant 0 : index
    %1 = vector.load %arg2[%c32, %c0_1] : memref<78x144xf32, #tpu.memory_space<vmem>>, vector<32x96xf32>
    %c64 = arith.constant 64 : index
    %c0_2 = arith.constant 0 : index
    %2 = vector.load %arg2[%c64, %c0_2] : memref<78x144xf32, #tpu.memory_space<vmem>>, vector<8x128xf32>
    %c72 = arith.constant 72 : index
    %c0_3 = arith.constant 0 : index
    %3 = vector.load %arg2[%c72, %c0_3] : memref<78x144xf32, #tpu.memory_space<vmem>>, vector<3x32xf32>
    %c77 = arith.constant 77 : index
    %c0_4 = arith.constant 0 : index
    %4 = vector.load %arg2[%c77, %c0_4] : memref<78x144xf32, #tpu.memory_space<vmem>>, vector<1x32xf32>
    %c76 = arith.constant 76 : index
    %c0_5 = arith.constant 0 : index
    %5 = vector.load %arg2[%c76, %c0_5] : memref<78x144xf32, #tpu.memory_space<vmem>>, vector<1x96xf32>
    %c75 = arith.constant 75 : index
    %c0_6 = arith.constant 0 : index
    %6 = vector.load %arg2[%c75, %c0_6] : memref<78x144xf32, #tpu.memory_space<vmem>>, vector<1x144xf32>
    %7 = vector.shape_cast %6 : vector<1x144xf32> to vector<1x144xf32>
    %8 = vector.broadcast %7 : vector<1x144xf32> to vector<8x144xf32>
    %9 = vector.shape_cast %5 : vector<1x96xf32> to vector<1x96xf32>
    %10 = vector.broadcast %9 : vector<1x96xf32> to vector<8x96xf32>
    %11 = vector.shape_cast %5 : vector<1x96xf32> to vector<1x96xf32>
    %12 = vector.broadcast %11 : vector<1x96xf32> to vector<40x96xf32>
    %c0_7 = arith.constant 0 : index
    %c0_8 = arith.constant 0 : index
    %13 = vector.load %arg0[%c0_7, %c0_8] : memref<64x3xf32, #tpu.memory_space<vmem>>, vector<64x3xf32>
    %cst = arith.constant dense<0.000000e+00> : vector<64x32xf32>
    %14 = tpu.matmul %13, %3, %cst {dimension_numbers = #tpu.dot_dimension_numbers<[1], [0], [0], [1], [0, 0, 1, 1], [], []>} : vector<64x3xf32>, vector<3x32xf32>, vector<64x32xf32> -> vector<64x32xf32>
    %15 = vector.broadcast %4 : vector<1x32xf32> to vector<64x32xf32>
    %16 = arith.addf %14, %15 : vector<64x32xf32>
    %17 = vector.extract_strided_slice %16 {offsets = [0, 0], sizes = [40, 32], strides = [1, 1]} : vector<64x32xf32> to vector<40x32xf32>
    %cst_9 = arith.constant 0.000000e+00 : f32
    %18 = vector.broadcast %cst_9 : f32 to vector<40x32xf32>
    %19 = arith.maximumf %17, %18 : vector<40x32xf32>
    %20 = vector.extract_strided_slice %16 {offsets = [40, 0], sizes = [24, 32], strides = [1, 1]} : vector<64x32xf32> to vector<24x32xf32>
    %cst_10 = arith.constant dense<0.000000e+00> : vector<40x96xf32>
    %21 = tpu.matmul %19, %1, %cst_10 {dimension_numbers = #tpu.dot_dimension_numbers<[1], [0], [0], [1], [0, 0, 1, 1], [], []>} : vector<40x32xf32>, vector<32x96xf32>, vector<40x96xf32> -> vector<40x96xf32>
    %22 = arith.addf %21, %12 : vector<40x96xf32>
    %c0_11 = arith.constant 0 : index
    %c0_12 = arith.constant 0 : index
    %23 = vector.load %arg1[%c0_11, %c0_12] : memref<64x8xf32, #tpu.memory_space<vmem>>, vector<64x8xf32>
    %24 = vector.extract_strided_slice %23 {offsets = [0, 0], sizes = [8, 8], strides = [1, 1]} : vector<64x8xf32> to vector<8x8xf32>
    %cst_13 = arith.constant dense<0.000000e+00> : vector<8x128xf32>
    %25 = tpu.matmul %24, %2, %cst_13 {dimension_numbers = #tpu.dot_dimension_numbers<[1], [0], [0], [1], [0, 0, 1, 1], [], []>} : vector<8x8xf32>, vector<8x128xf32>, vector<8x128xf32> -> vector<8x128xf32>
    %26 = vector.extract_strided_slice %22 {offsets = [0, 0], sizes = [8, 96], strides = [1, 1]} : vector<40x96xf32> to vector<8x96xf32>
    %27 = vector.extract_strided_slice %25 {offsets = [0, 0], sizes = [8, 96], strides = [1, 1]} : vector<8x128xf32> to vector<8x96xf32>
    %28 = arith.addf %26, %27 : vector<8x96xf32>
    %cst_14 = arith.constant 0.000000e+00 : f32
    %29 = vector.broadcast %cst_14 : f32 to vector<8x32xf32>
    %30 = vector.extract_strided_slice %28 {offsets = [0, 0], sizes = [8, 32], strides = [1, 1]} : vector<8x96xf32> to vector<8x32xf32>
    %31 = vector.extract_strided_slice %8 {offsets = [0, 16], sizes = [8, 32], strides = [1, 1]} : vector<8x144xf32> to vector<8x32xf32>
    %32 = arith.addf %30, %31 : vector<8x32xf32>
    %33 = arith.negf %32 : vector<8x32xf32>
    %34 = math.exp %33 : vector<8x32xf32>
    %cst_15 = arith.constant 1.000000e+00 : f32
    %35 = vector.broadcast %cst_15 : f32 to vector<8x32xf32>
    %36 = arith.addf %35, %34 : vector<8x32xf32>
    %37 = arith.divf %35, %36 : vector<8x32xf32>
    %38 = vector.extract_strided_slice %28 {offsets = [0, 32], sizes = [8, 32], strides = [1, 1]} : vector<8x96xf32> to vector<8x32xf32>
    %39 = vector.extract_strided_slice %8 {offsets = [0, 48], sizes = [8, 32], strides = [1, 1]} : vector<8x144xf32> to vector<8x32xf32>
    %40 = arith.addf %38, %39 : vector<8x32xf32>
    %41 = arith.negf %40 : vector<8x32xf32>
    %42 = math.exp %41 : vector<8x32xf32>
    %cst_16 = arith.constant 1.000000e+00 : f32
    %43 = vector.broadcast %cst_16 : f32 to vector<8x32xf32>
    %44 = arith.addf %43, %42 : vector<8x32xf32>
    %45 = arith.divf %43, %44 : vector<8x32xf32>
    %46 = vector.extract_strided_slice %28 {offsets = [0, 64], sizes = [8, 32], strides = [1, 1]} : vector<8x96xf32> to vector<8x32xf32>
    %47 = vector.extract_strided_slice %8 {offsets = [0, 80], sizes = [8, 32], strides = [1, 1]} : vector<8x144xf32> to vector<8x32xf32>
    %48 = arith.mulf %37, %47 : vector<8x32xf32>
    %49 = arith.addf %46, %48 : vector<8x32xf32>
    %50 = math.tanh %49 : vector<8x32xf32>
    %51 = arith.mulf %45, %29 : vector<8x32xf32>
    %cst_17 = arith.constant 1.000000e+00 : f32
    %52 = vector.broadcast %cst_17 : f32 to vector<8x32xf32>
    %53 = arith.subf %52, %45 : vector<8x32xf32>
    %54 = arith.mulf %53, %50 : vector<8x32xf32>
    %55 = arith.addf %51, %54 : vector<8x32xf32>
    %cst_18 = arith.constant dense<0.000000e+00> : vector<8x144xf32>
    %56 = tpu.matmul %55, %0, %cst_18 {dimension_numbers = #tpu.dot_dimension_numbers<[1], [0], [0], [1], [0, 0, 1, 1], [], []>} : vector<8x32xf32>, vector<32x144xf32>, vector<8x144xf32> -> vector<8x144xf32>
    %57 = arith.addf %56, %8 : vector<8x144xf32>
    %58 = vector.extract_strided_slice %57 {offsets = [0, 0], sizes = [8, 8], strides = [1, 1]} : vector<8x144xf32> to vector<8x8xf32>
    %59 = vector.extract_strided_slice %57 {offsets = [0, 8], sizes = [8, 8], strides = [1, 1]} : vector<8x144xf32> to vector<8x8xf32>
    %cst_19 = arith.constant 5.000000e-01 : f32
    %60 = vector.broadcast %cst_19 : f32 to vector<8x8xf32>
    %61 = arith.mulf %60, %59 : vector<8x8xf32>
    %62 = math.exp %61 : vector<8x8xf32>
    %63 = vector.extract_strided_slice %23 {offsets = [8, 0], sizes = [8, 8], strides = [1, 1]} : vector<64x8xf32> to vector<8x8xf32>
    %64 = arith.mulf %62, %63 : vector<8x8xf32>
    %65 = arith.addf %58, %64 : vector<8x8xf32>
    %cst_20 = arith.constant dense<0.000000e+00> : vector<8x128xf32>
    %66 = tpu.matmul %65, %2, %cst_20 {dimension_numbers = #tpu.dot_dimension_numbers<[1], [0], [0], [1], [0, 0, 1, 1], [], []>} : vector<8x8xf32>, vector<8x128xf32>, vector<8x128xf32> -> vector<8x128xf32>
    %67 = vector.extract_strided_slice %22 {offsets = [8, 0], sizes = [8, 96], strides = [1, 1]} : vector<40x96xf32> to vector<8x96xf32>
    %68 = vector.extract_strided_slice %66 {offsets = [0, 0], sizes = [8, 96], strides = [1, 1]} : vector<8x128xf32> to vector<8x96xf32>
    %69 = arith.addf %67, %68 : vector<8x96xf32>
    %70 = vector.extract_strided_slice %69 {offsets = [0, 0], sizes = [8, 32], strides = [1, 1]} : vector<8x96xf32> to vector<8x32xf32>
    %71 = vector.extract_strided_slice %57 {offsets = [0, 16], sizes = [8, 32], strides = [1, 1]} : vector<8x144xf32> to vector<8x32xf32>
    %72 = arith.addf %70, %71 : vector<8x32xf32>
    %73 = arith.negf %72 : vector<8x32xf32>
    %74 = math.exp %73 : vector<8x32xf32>
    %cst_21 = arith.constant 1.000000e+00 : f32
    %75 = vector.broadcast %cst_21 : f32 to vector<8x32xf32>
    %76 = arith.addf %75, %74 : vector<8x32xf32>
    %77 = arith.divf %75, %76 : vector<8x32xf32>
    %78 = vector.extract_strided_slice %69 {offsets = [0, 32], sizes = [8, 32], strides = [1, 1]} : vector<8x96xf32> to vector<8x32xf32>
    %79 = vector.extract_strided_slice %57 {offsets = [0, 48], sizes = [8, 32], strides = [1, 1]} : vector<8x144xf32> to vector<8x32xf32>
    %80 = arith.addf %78, %79 : vector<8x32xf32>
    %81 = arith.negf %80 : vector<8x32xf32>
    %82 = math.exp %81 : vector<8x32xf32>
    %cst_22 = arith.constant 1.000000e+00 : f32
    %83 = vector.broadcast %cst_22 : f32 to vector<8x32xf32>
    %84 = arith.addf %83, %82 : vector<8x32xf32>
    %85 = arith.divf %83, %84 : vector<8x32xf32>
    %86 = vector.extract_strided_slice %69 {offsets = [0, 64], sizes = [8, 32], strides = [1, 1]} : vector<8x96xf32> to vector<8x32xf32>
    %87 = vector.extract_strided_slice %57 {offsets = [0, 80], sizes = [8, 32], strides = [1, 1]} : vector<8x144xf32> to vector<8x32xf32>
    %88 = arith.mulf %77, %87 : vector<8x32xf32>
    %89 = arith.addf %86, %88 : vector<8x32xf32>
    %90 = math.tanh %89 : vector<8x32xf32>
    %91 = arith.mulf %85, %55 : vector<8x32xf32>
    %cst_23 = arith.constant 1.000000e+00 : f32
    %92 = vector.broadcast %cst_23 : f32 to vector<8x32xf32>
    %93 = arith.subf %92, %85 : vector<8x32xf32>
    %94 = arith.mulf %93, %90 : vector<8x32xf32>
    %95 = arith.addf %91, %94 : vector<8x32xf32>
    %cst_24 = arith.constant dense<0.000000e+00> : vector<8x144xf32>
    %96 = tpu.matmul %95, %0, %cst_24 {dimension_numbers = #tpu.dot_dimension_numbers<[1], [0], [0], [1], [0, 0, 1, 1], [], []>} : vector<8x32xf32>, vector<32x144xf32>, vector<8x144xf32> -> vector<8x144xf32>
    %97 = arith.addf %96, %8 : vector<8x144xf32>
    %98 = vector.extract_strided_slice %97 {offsets = [0, 0], sizes = [8, 8], strides = [1, 1]} : vector<8x144xf32> to vector<8x8xf32>
    %99 = vector.extract_strided_slice %97 {offsets = [0, 8], sizes = [8, 8], strides = [1, 1]} : vector<8x144xf32> to vector<8x8xf32>
    %cst_25 = arith.constant 5.000000e-01 : f32
    %100 = vector.broadcast %cst_25 : f32 to vector<8x8xf32>
    %101 = arith.mulf %100, %99 : vector<8x8xf32>
    %102 = math.exp %101 : vector<8x8xf32>
    %103 = vector.extract_strided_slice %23 {offsets = [16, 0], sizes = [8, 8], strides = [1, 1]} : vector<64x8xf32> to vector<8x8xf32>
    %104 = arith.mulf %102, %103 : vector<8x8xf32>
    %105 = arith.addf %98, %104 : vector<8x8xf32>
    %cst_26 = arith.constant dense<0.000000e+00> : vector<8x128xf32>
    %106 = tpu.matmul %105, %2, %cst_26 {dimension_numbers = #tpu.dot_dimension_numbers<[1], [0], [0], [1], [0, 0, 1, 1], [], []>} : vector<8x8xf32>, vector<8x128xf32>, vector<8x128xf32> -> vector<8x128xf32>
    %107 = vector.extract_strided_slice %22 {offsets = [16, 0], sizes = [8, 96], strides = [1, 1]} : vector<40x96xf32> to vector<8x96xf32>
    %108 = vector.extract_strided_slice %106 {offsets = [0, 0], sizes = [8, 96], strides = [1, 1]} : vector<8x128xf32> to vector<8x96xf32>
    %109 = arith.addf %107, %108 : vector<8x96xf32>
    %110 = vector.extract_strided_slice %109 {offsets = [0, 0], sizes = [8, 32], strides = [1, 1]} : vector<8x96xf32> to vector<8x32xf32>
    %111 = vector.extract_strided_slice %97 {offsets = [0, 16], sizes = [8, 32], strides = [1, 1]} : vector<8x144xf32> to vector<8x32xf32>
    %112 = arith.addf %110, %111 : vector<8x32xf32>
    %113 = arith.negf %112 : vector<8x32xf32>
    %114 = math.exp %113 : vector<8x32xf32>
    %cst_27 = arith.constant 1.000000e+00 : f32
    %115 = vector.broadcast %cst_27 : f32 to vector<8x32xf32>
    %116 = arith.addf %115, %114 : vector<8x32xf32>
    %117 = arith.divf %115, %116 : vector<8x32xf32>
    %118 = vector.extract_strided_slice %109 {offsets = [0, 32], sizes = [8, 32], strides = [1, 1]} : vector<8x96xf32> to vector<8x32xf32>
    %119 = vector.extract_strided_slice %97 {offsets = [0, 48], sizes = [8, 32], strides = [1, 1]} : vector<8x144xf32> to vector<8x32xf32>
    %120 = arith.addf %118, %119 : vector<8x32xf32>
    %121 = arith.negf %120 : vector<8x32xf32>
    %122 = math.exp %121 : vector<8x32xf32>
    %cst_28 = arith.constant 1.000000e+00 : f32
    %123 = vector.broadcast %cst_28 : f32 to vector<8x32xf32>
    %124 = arith.addf %123, %122 : vector<8x32xf32>
    %125 = arith.divf %123, %124 : vector<8x32xf32>
    %126 = vector.extract_strided_slice %109 {offsets = [0, 64], sizes = [8, 32], strides = [1, 1]} : vector<8x96xf32> to vector<8x32xf32>
    %127 = vector.extract_strided_slice %97 {offsets = [0, 80], sizes = [8, 32], strides = [1, 1]} : vector<8x144xf32> to vector<8x32xf32>
    %128 = arith.mulf %117, %127 : vector<8x32xf32>
    %129 = arith.addf %126, %128 : vector<8x32xf32>
    %130 = math.tanh %129 : vector<8x32xf32>
    %131 = arith.mulf %125, %95 : vector<8x32xf32>
    %cst_29 = arith.constant 1.000000e+00 : f32
    %132 = vector.broadcast %cst_29 : f32 to vector<8x32xf32>
    %133 = arith.subf %132, %125 : vector<8x32xf32>
    %134 = arith.mulf %133, %130 : vector<8x32xf32>
    %135 = arith.addf %131, %134 : vector<8x32xf32>
    %cst_30 = arith.constant dense<0.000000e+00> : vector<8x144xf32>
    %136 = tpu.matmul %135, %0, %cst_30 {dimension_numbers = #tpu.dot_dimension_numbers<[1], [0], [0], [1], [0, 0, 1, 1], [], []>} : vector<8x32xf32>, vector<32x144xf32>, vector<8x144xf32> -> vector<8x144xf32>
    %137 = arith.addf %136, %8 : vector<8x144xf32>
    %138 = vector.extract_strided_slice %137 {offsets = [0, 0], sizes = [8, 8], strides = [1, 1]} : vector<8x144xf32> to vector<8x8xf32>
    %139 = vector.extract_strided_slice %137 {offsets = [0, 8], sizes = [8, 8], strides = [1, 1]} : vector<8x144xf32> to vector<8x8xf32>
    %cst_31 = arith.constant 5.000000e-01 : f32
    %140 = vector.broadcast %cst_31 : f32 to vector<8x8xf32>
    %141 = arith.mulf %140, %139 : vector<8x8xf32>
    %142 = math.exp %141 : vector<8x8xf32>
    %143 = vector.extract_strided_slice %23 {offsets = [24, 0], sizes = [8, 8], strides = [1, 1]} : vector<64x8xf32> to vector<8x8xf32>
    %144 = arith.mulf %142, %143 : vector<8x8xf32>
    %145 = arith.addf %138, %144 : vector<8x8xf32>
    %cst_32 = arith.constant dense<0.000000e+00> : vector<8x128xf32>
    %146 = tpu.matmul %145, %2, %cst_32 {dimension_numbers = #tpu.dot_dimension_numbers<[1], [0], [0], [1], [0, 0, 1, 1], [], []>} : vector<8x8xf32>, vector<8x128xf32>, vector<8x128xf32> -> vector<8x128xf32>
    %147 = vector.extract_strided_slice %22 {offsets = [24, 0], sizes = [8, 96], strides = [1, 1]} : vector<40x96xf32> to vector<8x96xf32>
    %148 = vector.extract_strided_slice %146 {offsets = [0, 0], sizes = [8, 96], strides = [1, 1]} : vector<8x128xf32> to vector<8x96xf32>
    %149 = arith.addf %147, %148 : vector<8x96xf32>
    %150 = vector.extract_strided_slice %149 {offsets = [0, 0], sizes = [8, 32], strides = [1, 1]} : vector<8x96xf32> to vector<8x32xf32>
    %151 = vector.extract_strided_slice %137 {offsets = [0, 16], sizes = [8, 32], strides = [1, 1]} : vector<8x144xf32> to vector<8x32xf32>
    %152 = arith.addf %150, %151 : vector<8x32xf32>
    %153 = arith.negf %152 : vector<8x32xf32>
    %154 = math.exp %153 : vector<8x32xf32>
    %cst_33 = arith.constant 1.000000e+00 : f32
    %155 = vector.broadcast %cst_33 : f32 to vector<8x32xf32>
    %156 = arith.addf %155, %154 : vector<8x32xf32>
    %157 = arith.divf %155, %156 : vector<8x32xf32>
    %158 = vector.extract_strided_slice %149 {offsets = [0, 32], sizes = [8, 32], strides = [1, 1]} : vector<8x96xf32> to vector<8x32xf32>
    %159 = vector.extract_strided_slice %137 {offsets = [0, 48], sizes = [8, 32], strides = [1, 1]} : vector<8x144xf32> to vector<8x32xf32>
    %160 = arith.addf %158, %159 : vector<8x32xf32>
    %161 = arith.negf %160 : vector<8x32xf32>
    %162 = math.exp %161 : vector<8x32xf32>
    %cst_34 = arith.constant 1.000000e+00 : f32
    %163 = vector.broadcast %cst_34 : f32 to vector<8x32xf32>
    %164 = arith.addf %163, %162 : vector<8x32xf32>
    %165 = arith.divf %163, %164 : vector<8x32xf32>
    %166 = vector.extract_strided_slice %149 {offsets = [0, 64], sizes = [8, 32], strides = [1, 1]} : vector<8x96xf32> to vector<8x32xf32>
    %167 = vector.extract_strided_slice %137 {offsets = [0, 80], sizes = [8, 32], strides = [1, 1]} : vector<8x144xf32> to vector<8x32xf32>
    %168 = arith.mulf %157, %167 : vector<8x32xf32>
    %169 = arith.addf %166, %168 : vector<8x32xf32>
    %170 = math.tanh %169 : vector<8x32xf32>
    %171 = arith.mulf %165, %135 : vector<8x32xf32>
    %cst_35 = arith.constant 1.000000e+00 : f32
    %172 = vector.broadcast %cst_35 : f32 to vector<8x32xf32>
    %173 = arith.subf %172, %165 : vector<8x32xf32>
    %174 = arith.mulf %173, %170 : vector<8x32xf32>
    %175 = arith.addf %171, %174 : vector<8x32xf32>
    %cst_36 = arith.constant dense<0.000000e+00> : vector<8x144xf32>
    %176 = tpu.matmul %175, %0, %cst_36 {dimension_numbers = #tpu.dot_dimension_numbers<[1], [0], [0], [1], [0, 0, 1, 1], [], []>} : vector<8x32xf32>, vector<32x144xf32>, vector<8x144xf32> -> vector<8x144xf32>
    %177 = arith.addf %176, %8 : vector<8x144xf32>
    %178 = vector.extract_strided_slice %177 {offsets = [0, 0], sizes = [8, 8], strides = [1, 1]} : vector<8x144xf32> to vector<8x8xf32>
    %179 = vector.extract_strided_slice %177 {offsets = [0, 8], sizes = [8, 8], strides = [1, 1]} : vector<8x144xf32> to vector<8x8xf32>
    %cst_37 = arith.constant 5.000000e-01 : f32
    %180 = vector.broadcast %cst_37 : f32 to vector<8x8xf32>
    %181 = arith.mulf %180, %179 : vector<8x8xf32>
    %182 = math.exp %181 : vector<8x8xf32>
    %183 = vector.extract_strided_slice %23 {offsets = [32, 0], sizes = [8, 8], strides = [1, 1]} : vector<64x8xf32> to vector<8x8xf32>
    %184 = arith.mulf %182, %183 : vector<8x8xf32>
    %185 = arith.addf %178, %184 : vector<8x8xf32>
    %cst_38 = arith.constant dense<0.000000e+00> : vector<8x128xf32>
    %186 = tpu.matmul %185, %2, %cst_38 {dimension_numbers = #tpu.dot_dimension_numbers<[1], [0], [0], [1], [0, 0, 1, 1], [], []>} : vector<8x8xf32>, vector<8x128xf32>, vector<8x128xf32> -> vector<8x128xf32>
    %187 = vector.extract_strided_slice %22 {offsets = [32, 0], sizes = [8, 96], strides = [1, 1]} : vector<40x96xf32> to vector<8x96xf32>
    %188 = vector.extract_strided_slice %186 {offsets = [0, 0], sizes = [8, 96], strides = [1, 1]} : vector<8x128xf32> to vector<8x96xf32>
    %189 = arith.addf %187, %188 : vector<8x96xf32>
    %190 = vector.extract_strided_slice %189 {offsets = [0, 0], sizes = [8, 32], strides = [1, 1]} : vector<8x96xf32> to vector<8x32xf32>
    %191 = vector.extract_strided_slice %177 {offsets = [0, 16], sizes = [8, 32], strides = [1, 1]} : vector<8x144xf32> to vector<8x32xf32>
    %192 = arith.addf %190, %191 : vector<8x32xf32>
    %193 = arith.negf %192 : vector<8x32xf32>
    %194 = math.exp %193 : vector<8x32xf32>
    %cst_39 = arith.constant 1.000000e+00 : f32
    %195 = vector.broadcast %cst_39 : f32 to vector<8x32xf32>
    %196 = arith.addf %195, %194 : vector<8x32xf32>
    %197 = arith.divf %195, %196 : vector<8x32xf32>
    %198 = vector.extract_strided_slice %189 {offsets = [0, 32], sizes = [8, 32], strides = [1, 1]} : vector<8x96xf32> to vector<8x32xf32>
    %199 = vector.extract_strided_slice %177 {offsets = [0, 48], sizes = [8, 32], strides = [1, 1]} : vector<8x144xf32> to vector<8x32xf32>
    %200 = arith.addf %198, %199 : vector<8x32xf32>
    %201 = arith.negf %200 : vector<8x32xf32>
    %202 = math.exp %201 : vector<8x32xf32>
    %cst_40 = arith.constant 1.000000e+00 : f32
    %203 = vector.broadcast %cst_40 : f32 to vector<8x32xf32>
    %204 = arith.addf %203, %202 : vector<8x32xf32>
    %205 = arith.divf %203, %204 : vector<8x32xf32>
    %206 = vector.extract_strided_slice %189 {offsets = [0, 64], sizes = [8, 32], strides = [1, 1]} : vector<8x96xf32> to vector<8x32xf32>
    %207 = vector.extract_strided_slice %177 {offsets = [0, 80], sizes = [8, 32], strides = [1, 1]} : vector<8x144xf32> to vector<8x32xf32>
    %208 = arith.mulf %197, %207 : vector<8x32xf32>
    %209 = arith.addf %206, %208 : vector<8x32xf32>
    %210 = math.tanh %209 : vector<8x32xf32>
    %211 = arith.mulf %205, %175 : vector<8x32xf32>
    %cst_41 = arith.constant 1.000000e+00 : f32
    %212 = vector.broadcast %cst_41 : f32 to vector<8x32xf32>
    %213 = arith.subf %212, %205 : vector<8x32xf32>
    %214 = arith.mulf %213, %210 : vector<8x32xf32>
    %215 = arith.addf %211, %214 : vector<8x32xf32>
    %cst_42 = arith.constant dense<0.000000e+00> : vector<8x144xf32>
    %216 = tpu.matmul %215, %0, %cst_42 {dimension_numbers = #tpu.dot_dimension_numbers<[1], [0], [0], [1], [0, 0, 1, 1], [], []>} : vector<8x32xf32>, vector<32x144xf32>, vector<8x144xf32> -> vector<8x144xf32>
    %217 = arith.addf %216, %8 : vector<8x144xf32>
    %218 = vector.extract_strided_slice %217 {offsets = [0, 0], sizes = [8, 8], strides = [1, 1]} : vector<8x144xf32> to vector<8x8xf32>
    %219 = vector.extract_strided_slice %217 {offsets = [0, 8], sizes = [8, 8], strides = [1, 1]} : vector<8x144xf32> to vector<8x8xf32>
    %cst_43 = arith.constant 5.000000e-01 : f32
    %220 = vector.broadcast %cst_43 : f32 to vector<8x8xf32>
    %221 = arith.mulf %220, %219 : vector<8x8xf32>
    %222 = math.exp %221 : vector<8x8xf32>
    %223 = vector.extract_strided_slice %23 {offsets = [40, 0], sizes = [8, 8], strides = [1, 1]} : vector<64x8xf32> to vector<8x8xf32>
    %224 = arith.mulf %222, %223 : vector<8x8xf32>
    %225 = arith.addf %218, %224 : vector<8x8xf32>
    %cst_44 = arith.constant dense<0.000000e+00> : vector<8x128xf32>
    %226 = tpu.matmul %225, %2, %cst_44 {dimension_numbers = #tpu.dot_dimension_numbers<[1], [0], [0], [1], [0, 0, 1, 1], [], []>} : vector<8x8xf32>, vector<8x128xf32>, vector<8x128xf32> -> vector<8x128xf32>
    %227 = vector.extract_strided_slice %217 {offsets = [0, 112], sizes = [8, 32], strides = [1, 1]} : vector<8x144xf32> to vector<8x32xf32>
    %228 = vector.extract_strided_slice %226 {offsets = [0, 96], sizes = [8, 32], strides = [1, 1]} : vector<8x128xf32> to vector<8x32xf32>
    %229 = arith.addf %227, %228 : vector<8x32xf32>
    %cst_45 = arith.constant dense<0.000000e+00> : vector<8x96xf32>
    %230 = tpu.matmul %229, %1, %cst_45 {dimension_numbers = #tpu.dot_dimension_numbers<[1], [0], [0], [1], [0, 0, 1, 1], [], []>} : vector<8x32xf32>, vector<32x96xf32>, vector<8x96xf32> -> vector<8x96xf32>
    %231 = arith.addf %230, %10 : vector<8x96xf32>
    %232 = vector.extract_strided_slice %226 {offsets = [0, 0], sizes = [8, 96], strides = [1, 1]} : vector<8x128xf32> to vector<8x96xf32>
    %233 = arith.addf %231, %232 : vector<8x96xf32>
    %234 = vector.extract_strided_slice %233 {offsets = [0, 0], sizes = [8, 32], strides = [1, 1]} : vector<8x96xf32> to vector<8x32xf32>
    %235 = vector.extract_strided_slice %217 {offsets = [0, 16], sizes = [8, 32], strides = [1, 1]} : vector<8x144xf32> to vector<8x32xf32>
    %236 = arith.addf %234, %235 : vector<8x32xf32>
    %237 = arith.negf %236 : vector<8x32xf32>
    %238 = math.exp %237 : vector<8x32xf32>
    %cst_46 = arith.constant 1.000000e+00 : f32
    %239 = vector.broadcast %cst_46 : f32 to vector<8x32xf32>
    %240 = arith.addf %239, %238 : vector<8x32xf32>
    %241 = arith.divf %239, %240 : vector<8x32xf32>
    %242 = vector.extract_strided_slice %233 {offsets = [0, 32], sizes = [8, 32], strides = [1, 1]} : vector<8x96xf32> to vector<8x32xf32>
    %243 = vector.extract_strided_slice %217 {offsets = [0, 48], sizes = [8, 32], strides = [1, 1]} : vector<8x144xf32> to vector<8x32xf32>
    %244 = arith.addf %242, %243 : vector<8x32xf32>
    %245 = arith.negf %244 : vector<8x32xf32>
    %246 = math.exp %245 : vector<8x32xf32>
    %cst_47 = arith.constant 1.000000e+00 : f32
    %247 = vector.broadcast %cst_47 : f32 to vector<8x32xf32>
    %248 = arith.addf %247, %246 : vector<8x32xf32>
    %249 = arith.divf %247, %248 : vector<8x32xf32>
    %250 = vector.extract_strided_slice %233 {offsets = [0, 64], sizes = [8, 32], strides = [1, 1]} : vector<8x96xf32> to vector<8x32xf32>
    %251 = vector.extract_strided_slice %217 {offsets = [0, 80], sizes = [8, 32], strides = [1, 1]} : vector<8x144xf32> to vector<8x32xf32>
    %252 = arith.mulf %241, %251 : vector<8x32xf32>
    %253 = arith.addf %250, %252 : vector<8x32xf32>
    %254 = math.tanh %253 : vector<8x32xf32>
    %255 = arith.mulf %249, %215 : vector<8x32xf32>
    %cst_48 = arith.constant 1.000000e+00 : f32
    %256 = vector.broadcast %cst_48 : f32 to vector<8x32xf32>
    %257 = arith.subf %256, %249 : vector<8x32xf32>
    %258 = arith.mulf %257, %254 : vector<8x32xf32>
    %259 = arith.addf %255, %258 : vector<8x32xf32>
    %cst_49 = arith.constant dense<0.000000e+00> : vector<8x144xf32>
    %260 = tpu.matmul %259, %0, %cst_49 {dimension_numbers = #tpu.dot_dimension_numbers<[1], [0], [0], [1], [0, 0, 1, 1], [], []>} : vector<8x32xf32>, vector<32x144xf32>, vector<8x144xf32> -> vector<8x144xf32>
    %261 = arith.addf %260, %8 : vector<8x144xf32>
    %262 = vector.extract_strided_slice %261 {offsets = [0, 0], sizes = [8, 8], strides = [1, 1]} : vector<8x144xf32> to vector<8x8xf32>
    %263 = vector.extract_strided_slice %261 {offsets = [0, 8], sizes = [8, 8], strides = [1, 1]} : vector<8x144xf32> to vector<8x8xf32>
    %cst_50 = arith.constant 5.000000e-01 : f32
    %264 = vector.broadcast %cst_50 : f32 to vector<8x8xf32>
    %265 = arith.mulf %264, %263 : vector<8x8xf32>
    %266 = math.exp %265 : vector<8x8xf32>
    %267 = vector.extract_strided_slice %23 {offsets = [48, 0], sizes = [8, 8], strides = [1, 1]} : vector<64x8xf32> to vector<8x8xf32>
    %268 = arith.mulf %266, %267 : vector<8x8xf32>
    %269 = arith.addf %262, %268 : vector<8x8xf32>
    %cst_51 = arith.constant dense<0.000000e+00> : vector<8x128xf32>
    %270 = tpu.matmul %269, %2, %cst_51 {dimension_numbers = #tpu.dot_dimension_numbers<[1], [0], [0], [1], [0, 0, 1, 1], [], []>} : vector<8x8xf32>, vector<8x128xf32>, vector<8x128xf32> -> vector<8x128xf32>
    %271 = vector.extract_strided_slice %261 {offsets = [0, 112], sizes = [8, 32], strides = [1, 1]} : vector<8x144xf32> to vector<8x32xf32>
    %272 = vector.extract_strided_slice %270 {offsets = [0, 96], sizes = [8, 32], strides = [1, 1]} : vector<8x128xf32> to vector<8x32xf32>
    %273 = arith.addf %271, %272 : vector<8x32xf32>
    %cst_52 = arith.constant dense<0.000000e+00> : vector<8x96xf32>
    %274 = tpu.matmul %273, %1, %cst_52 {dimension_numbers = #tpu.dot_dimension_numbers<[1], [0], [0], [1], [0, 0, 1, 1], [], []>} : vector<8x32xf32>, vector<32x96xf32>, vector<8x96xf32> -> vector<8x96xf32>
    %275 = arith.addf %274, %10 : vector<8x96xf32>
    %276 = vector.extract_strided_slice %270 {offsets = [0, 0], sizes = [8, 96], strides = [1, 1]} : vector<8x128xf32> to vector<8x96xf32>
    %277 = arith.addf %275, %276 : vector<8x96xf32>
    %278 = vector.extract_strided_slice %277 {offsets = [0, 0], sizes = [8, 32], strides = [1, 1]} : vector<8x96xf32> to vector<8x32xf32>
    %279 = vector.extract_strided_slice %261 {offsets = [0, 16], sizes = [8, 32], strides = [1, 1]} : vector<8x144xf32> to vector<8x32xf32>
    %280 = arith.addf %278, %279 : vector<8x32xf32>
    %281 = arith.negf %280 : vector<8x32xf32>
    %282 = math.exp %281 : vector<8x32xf32>
    %cst_53 = arith.constant 1.000000e+00 : f32
    %283 = vector.broadcast %cst_53 : f32 to vector<8x32xf32>
    %284 = arith.addf %283, %282 : vector<8x32xf32>
    %285 = arith.divf %283, %284 : vector<8x32xf32>
    %286 = vector.extract_strided_slice %277 {offsets = [0, 32], sizes = [8, 32], strides = [1, 1]} : vector<8x96xf32> to vector<8x32xf32>
    %287 = vector.extract_strided_slice %261 {offsets = [0, 48], sizes = [8, 32], strides = [1, 1]} : vector<8x144xf32> to vector<8x32xf32>
    %288 = arith.addf %286, %287 : vector<8x32xf32>
    %289 = arith.negf %288 : vector<8x32xf32>
    %290 = math.exp %289 : vector<8x32xf32>
    %cst_54 = arith.constant 1.000000e+00 : f32
    %291 = vector.broadcast %cst_54 : f32 to vector<8x32xf32>
    %292 = arith.addf %291, %290 : vector<8x32xf32>
    %293 = arith.divf %291, %292 : vector<8x32xf32>
    %294 = vector.extract_strided_slice %277 {offsets = [0, 64], sizes = [8, 32], strides = [1, 1]} : vector<8x96xf32> to vector<8x32xf32>
    %295 = vector.extract_strided_slice %261 {offsets = [0, 80], sizes = [8, 32], strides = [1, 1]} : vector<8x144xf32> to vector<8x32xf32>
    %296 = arith.mulf %285, %295 : vector<8x32xf32>
    %297 = arith.addf %294, %296 : vector<8x32xf32>
    %298 = math.tanh %297 : vector<8x32xf32>
    %299 = arith.mulf %293, %259 : vector<8x32xf32>
    %cst_55 = arith.constant 1.000000e+00 : f32
    %300 = vector.broadcast %cst_55 : f32 to vector<8x32xf32>
    %301 = arith.subf %300, %293 : vector<8x32xf32>
    %302 = arith.mulf %301, %298 : vector<8x32xf32>
    %303 = arith.addf %299, %302 : vector<8x32xf32>
    %cst_56 = arith.constant dense<0.000000e+00> : vector<8x144xf32>
    %304 = tpu.matmul %303, %0, %cst_56 {dimension_numbers = #tpu.dot_dimension_numbers<[1], [0], [0], [1], [0, 0, 1, 1], [], []>} : vector<8x32xf32>, vector<32x144xf32>, vector<8x144xf32> -> vector<8x144xf32>
    %305 = arith.addf %304, %8 : vector<8x144xf32>
    %306 = vector.extract_strided_slice %305 {offsets = [0, 0], sizes = [8, 8], strides = [1, 1]} : vector<8x144xf32> to vector<8x8xf32>
    %307 = vector.extract_strided_slice %305 {offsets = [0, 8], sizes = [8, 8], strides = [1, 1]} : vector<8x144xf32> to vector<8x8xf32>
    %cst_57 = arith.constant 5.000000e-01 : f32
    %308 = vector.broadcast %cst_57 : f32 to vector<8x8xf32>
    %309 = arith.mulf %308, %307 : vector<8x8xf32>
    %310 = math.exp %309 : vector<8x8xf32>
    %311 = vector.extract_strided_slice %23 {offsets = [56, 0], sizes = [8, 8], strides = [1, 1]} : vector<64x8xf32> to vector<8x8xf32>
    %312 = arith.mulf %310, %311 : vector<8x8xf32>
    %313 = arith.addf %306, %312 : vector<8x8xf32>
    %cst_58 = arith.constant dense<0.000000e+00> : vector<8x128xf32>
    %314 = tpu.matmul %313, %2, %cst_58 {dimension_numbers = #tpu.dot_dimension_numbers<[1], [0], [0], [1], [0, 0, 1, 1], [], []>} : vector<8x8xf32>, vector<8x128xf32>, vector<8x128xf32> -> vector<8x128xf32>
    %315 = vector.extract_strided_slice %305 {offsets = [0, 112], sizes = [8, 32], strides = [1, 1]} : vector<8x144xf32> to vector<8x32xf32>
    %316 = vector.extract_strided_slice %314 {offsets = [0, 96], sizes = [8, 32], strides = [1, 1]} : vector<8x128xf32> to vector<8x32xf32>
    %317 = arith.addf %315, %316 : vector<8x32xf32>
    %318 = vector.extract_strided_slice %229 {offsets = [0, 0], sizes = [4, 32], strides = [1, 1]} : vector<8x32xf32> to vector<4x32xf32>
    %319 = vector.extract_strided_slice %273 {offsets = [0, 0], sizes = [4, 32], strides = [1, 1]} : vector<8x32xf32> to vector<4x32xf32>
    %320 = vector.extract_strided_slice %317 {offsets = [0, 0], sizes = [4, 32], strides = [1, 1]} : vector<8x32xf32> to vector<4x32xf32>
    %321 = vector.extract_strided_slice %229 {offsets = [4, 0], sizes = [4, 32], strides = [1, 1]} : vector<8x32xf32> to vector<4x32xf32>
    %322 = vector.extract_strided_slice %273 {offsets = [4, 0], sizes = [4, 32], strides = [1, 1]} : vector<8x32xf32> to vector<4x32xf32>
    %323 = vector.extract_strided_slice %317 {offsets = [4, 0], sizes = [4, 32], strides = [1, 1]} : vector<8x32xf32> to vector<4x32xf32>
    %324 = tpu.concatenate %318, %319, %320, %321, %322, %323 in 0 : vector<4x32xf32>, vector<4x32xf32>, vector<4x32xf32>, vector<4x32xf32>, vector<4x32xf32>, vector<4x32xf32> -> vector<24x32xf32>
    %cst_59 = arith.constant dense<0.000000e+00> : vector<24x24xf32>
    %325 = tpu.matmul %324, %20, %cst_59 {dimension_numbers = #tpu.dot_dimension_numbers<[1], [1], [0], [0], [0, 0, 1, 0], [], []>} : vector<24x32xf32>, vector<24x32xf32>, vector<24x24xf32> -> vector<24x24xf32>
    %c0_60 = arith.constant 0 : index
    %c0_61 = arith.constant 0 : index
    %326 = vector.load %arg3[%c0_60, %c0_61] : memref<24x24xf32, #tpu.memory_space<vmem>>, vector<24x24xf32>
    tpu.vector_store %arg3[%c0_60, %c0_61], %325 {strides = array<i32>} : memref<24x24xf32, #tpu.memory_space<vmem>>, vector<24x24xf32>,
    return
  }
}

</mosaic_0001>

<bundles_post_ra>
// kernel: dpc_vrnn_forward.1
= control target key start
LH: loop header
LB: loop body
LE: loop exit
PB: predicated region body
PF: predicated region fallthrough
CT: control target
= control target key end

     0   :  { %vm77_vm0 = vcmask 1042432   ;;  %vm52_vm1 = vcmask 23552   ;;  %s2843_s0 = inlined_call_operand.vmem [shape: f32[64,3], index: 0, kind: input, shape index: {}]   ;;  %s2844_s1 = inlined_call_operand.vmem [shape: f32[64,8], index: 1, kind: input, shape index: {}]   ;;  %s2845_s2 = inlined_call_operand.vmem [shape: f32[78,144], index: 2, kind: input, shape index: {}]   ;;  %s2846_s3 = inlined_call_operand.hbm [shape: f32[24,24], index: 3, kind: output, shape index: {}]  }
   0x1   :  { %v28_v0 = vld [vmem:[%s2845_s2 + $0x90] sm:$0x7]  ;;  %v44_v1 = vld [vmem:[%s2843_s0] sm:$0xff]  ;;  %v45_v2 = vld [vmem:[%s2843_s0 + $0x8] sm:$0xff] }
   0x2   :  { %2137 = vmatprep.subr.msk.mxu0 %vm77_vm0, %v28_v0  ;;  %2139 = vmatprep.mubr.msk.f32.mxu0 %vm52_vm1, %v44_v1  ;;  %v46_v3 = vld [vmem:[%s2843_s0 + $0x10] sm:$0xff]  ;;  %v47_v4 = vld [vmem:[%s2843_s0 + $0x18] sm:$0xff]  ;;  %v48_v5 = vld [vmem:[%s2843_s0 + $0x20] sm:$0xff] }
   0x3   :  { %2138 = vmatpush3.msk.msra.mxu0 %vm77_vm0, %v28_v0  ;;  %2251 = vmatprep.subr.msk.mxu1 %vm77_vm0, %v28_v0  ;;  %v2396_v6 = vld [vmem:[%s2845_s2 + $0x70] sm:$0xff] }
   0x4   :  { %2140 = vmatmul.mubr.msk.f32.vlgmr.msra.gmra.mxu0 %vm52_vm1, %v45_v2  ;;  %2252 = vmatpush3.msk.msra.mxu1 %vm77_vm0, %v28_v0 }
   0x5   :  { %8 = vsyncpa [#allocation3], 0  ;;  %2142 = vmatprep.mubr.msk.f32.mxu1 %vm52_vm1, %v46_v3  ;;  %v2342_v7 = vmov 0.0   ;;  %v2404_v8 = vld [vmem:[%s2845_s2 + $0x60] sm:$0xff]  ;;  %v49_v9 = vld [vmem:[%s2843_s0 + $0x28] sm:$0xff]  ;;  %vm305_vm2 = vcmask 64512   ;;  %v34_v16 = vlaneseq }
   0x6   :  { %2151 = vmatprep.subr.mxu1 %v2342_v7  ;;  %2143 = vmatmul.mubr.msk.f32.vlgmr.msra.gmra.mxu1 %vm52_vm1, %v47_v4  ;;  %v50_v10 = vld [vmem:[%s2843_s0 + $0x30] sm:$0xff]  ;;  %v51_v11 = vld [vmem:[%s2843_s0 + $0x38] sm:$0xff]  ;;  %v2434_v13 = vld [vmem:[%s2845_s2 + $0x40] sm:$0xff]  ;;  %vm2343_vm3 = vmmov 0   ;;  %s2344_s16 = smov 112   ;;  %s2345_s17 = smov 48  }
   0x7   :  { %2174 = vmatprep.subr.mxu0 %v2342_v7  ;;  %2145 = vmatprep.mubr.msk.f32.mxu1 %vm52_vm1, %v48_v5  ;;  %v2427_v12 = vld [vmem:[%s2845_s2 + $0x50] sm:$0xff]  ;;  %v2439_v14 = vld [vmem:[%s2845_s2 + $0x80] sm:$0xff]  ;;  %v2453_v17 = vshrl.u32 %v34_v16, 7  ;;  %vm191_vm4 = vcmask 261120   ;;  %s2346_s22 = smov 64   ;;  %v2519_v1 = vld [vmem:[%s2845_s2 + $0x38] sm:$0xff] }
   0x8   :  { %2152 = vmatpush3.msra.mxu1 %v2396_v6  ;;  %2175 = vmatpush3.msra.mxu0 %v2439_v14  ;;  %v297_v15 = vld [vmem:[%s2844_s1] sm:$0xff]  ;;  %v2458_v18 = vld [vmem:[%s2845_s2 + $0x93] ss:$8 sm:$0x3]  ;;  %v2471_v22 = vld [vmem:[%s2845_s2 + $0x95] ss:$0 sm:$0xff] }
   0x9   :  { %2153 = vmatprep.subr.mxu1 %v2342_v7  ;;  %2176 = vmatprep.mubr.msk.f32.mxu0 %vm2343_vm3, %v2342_v7  ;;  %v36_v19 = vsub.s32 0, %v2453_v17  ;;  %v2504_v42 = vld [vmem:[%s2845_s2 + $0x94] ss:$0 sm:$0xff]  ;;  %v2529_v3 = vld [vmem:[%s2845_s2 + $0x28] sm:$0xff]  ;;  %v2535_v4 = vld [vmem:[%s2845_s2 + $0x20] sm:$0xff]  ;;  %s2347_s10 = smov 96  }
   0xa   :  { %2154 = vmatpush3.msra.mxu1 %v2404_v8  ;;  %2177 = vmatmul.mubr.msk.f32.vlgmr.msra.gmra.mxu0 %vm305_vm2, %v297_v15  ;;  %v2524_v2 = vld [vmem:[%s2845_s2 + $0x30] sm:$0xff]  ;;  %v2541_v5 = vld [vmem:[%s2845_s2 + $0x18] sm:$0xff]  ;;  %v2562_v15 = vld [vmem:[%s2845_s2] sm:$0xff]  ;;  %s2348_s14 = smov 8   ;;  %s2350_s26 = smov 16   ;;  %vm1346_vm5 = vcmask 130048  }
   0xb   :  { %2146 = vmatmul.mubr.msk.f32.gmra.mxu1 %vm52_vm1, %v49_v9  ;;  %2155 = vmatprep.subr.mxu1 %v2342_v7  ;;  %v2462_v20 = vrot.slane %v2458_v18, %v36_v19  ;;  %v2547_v9 = vld [vmem:[%s2845_s2 + $0x10] sm:$0xff]  ;;  %v298_v16 = vld [vmem:[%s2844_s1 + $0x8] sm:$0xff]  ;;  %vm1899_vm6 = vcmask 1043456   ;;  %vm2022_vm7 = vcmask 195584  }
   0xc   :  { %2148 = vmatprep.mubr.msk.f32.mxu1 %vm52_vm1, %v50_v10  ;;  %2156 = vmatpush3.msra.mxu1 %v2427_v12  ;;  %v2553_v10 = vld [vmem:[%s2845_s2 + $0x8] sm:$0xff]  ;;  %s2349_s2 = smov 120  }
   0xd   :  { %2157 = vmatprep.subr.mxu1 %v2342_v7  ;;  %477 = vmatprep.mubr.f32.mxu0 %v2342_v7 }
   0xe   :  { %2158 = vmatpush3.msra.mxu1 %v2434_v13  ;;  %380 = vrot.lane.b32.xlu0 %v2462_v20, %s2344_s16 }
   0xf   :  { %2149 = vmatmul.mubr.msk.f32.gmra.mxu1 %vm52_vm1, %v51_v11  ;;  %2179 = vmatprep.subr.mxu1 %v2342_v7 }
  0x10   :  { %2159 = vmatprep.mubr.msk.f32.mxu1 %vm2343_vm3, %v2342_v7  ;;  %437 = vmatprep.subr.mxu0 %v2519_v1 }
  0x11   :  { %438 = vmatpush1.msra.mxu0 %v2524_v2 }
  0x12   :  { %390 = vrot.lane.b32.xlu0 %v2462_v20, %s2345_s17  ;;  %439 = vmatprep.subr.mxu0 %v2529_v3 }
  0x13   :  { %440 = vmatpush1.msra.mxu0 %v2535_v4 }
  0x14   :  { %441 = vmatprep.subr.mxu0 %v2541_v5 }
  0x15   :  { %442 = vmatpush1.msra.mxu0 %v2547_v9 }
  0x16   :  { %443 = vmatprep.subr.mxu0 %v2553_v10 }
  0x17   :  { %444 = vmatpush1.msra.mxu0 %v2562_v15 }
  0x18   :  { %628 = vmatprep.subr.mxu0 %v2519_v1 }
  0x80   :  { %v381_v46 = vpop.permute.xlu0 %380 }
  0x84   :  { %v391_v54 = vpop.permute.xlu0 %390 }
  0xc4   :  { %v2141_v21 = vpop.f32.mrf.mxu0 }
  0xc5   :  { %v153_v27 = vadd.f32 %v2141_v21, %v2471_v22 }
  0xc6   :  { %v147_v23 = vpop.f32.mrf.mxu0  ;;  %v2144_v24 = vpop.f32.mrf.mxu1 }
  0xc7   :  { %v148_v25 = vadd.f32 %v147_v23, %v2471_v22  ;;  %v187_v31 = vmax.f32 %v153_v27, 0.0  ;;  %v163_v32 = vadd.f32 %v2144_v24, %v2471_v22 }
  0xc8   :  { %v157_v26 = vpop.f32.mrf.mxu1 }
  0xc9   :  { %v186_v28 = vmax.f32 %v148_v25, 0.0  ;;  %v158_v29 = vadd.f32 %v157_v26, %v2471_v22  ;;  %v189_v35 = vmax.f32 %v163_v32, 0.0 }
  0xca   :  { %v375_v38 = vpop.f32.mrf.mxu0 }
  0xcb   :  { %2160 = vmatmul.mubr.msk.f32.vlgmr.msra.gmra.mxu1 %vm191_vm4, %v186_v28  ;;  %v2479_v30 = vpop.f32.mrf.mxu1  ;;  %v188_v33 = vmax.f32 %v158_v29, 0.0 }
  0xcc   :  { %2162 = vmatprep.mubr.msk.f32.mxu1 %vm2343_vm3, %v2342_v7  ;;  %2180 = vmatpush3.msra.mxu1 %v2439_v14  ;;  %v2178_v39 = vpop.f32.mrf.mxu0 }
  0xcd   :  { %2184 = vmatprep.subr.mxu1 %v2342_v7  ;;  %v167_v34 = vpop.f32.mrf.mxu1 }
  0xce   :  { %v168_v36 = vadd.f32 %v167_v34, %v2471_v22 }
  0xcf   :  { %2163 = vmatmul.mubr.msk.f32.gmra.mxu1 %vm191_vm4, %v187_v31  ;;  %v2497_v40 = vpop.f32.mrf.mxu1 }
  0xd0   :  { %2165 = vmatprep.mubr.msk.f32.mxu1 %vm2343_vm3, %v2342_v7  ;;  %v190_v37 = vmax.f32 %v168_v36, 0.0 }
  0xd1   :  { %v2499_v41 = vpop.f32.mrf.mxu1 }
  0xd3   :  { %2166 = vmatmul.mubr.msk.f32.gmra.mxu1 %vm191_vm4, %v188_v33 }
  0xd4   :  { %2168 = vmatprep.mubr.msk.f32.mxu1 %vm2343_vm3, %v2342_v7 }
  0xd7   :  { %2169 = vmatmul.mubr.msk.f32.gmra.mxu1 %vm191_vm4, %v189_v35 }
  0xd8   :  { %2171 = vmatprep.mubr.msk.f32.mxu1 %vm2343_vm3, %v2342_v7 }
  0xdb   :  { %2172 = vmatmul.mubr.msk.f32.gmra.mxu1 %vm191_vm4, %v190_v37 }
  0xdc   :  { %2181 = vmatprep.mubr.msk.f32.mxu1 %vm2343_vm3, %v2342_v7 }
 0x18b   :  { %v273_v43 = vpop.f32.mrf.mxu1 }
 0x18c   :  { %v274_v44 = vadd.f32 %v273_v43, %v2504_v42 }
 0x18d   :  { %v2161_v45 = vpop.f32.mrf.mxu1 }
 0x18e   :  { %v379_v47 = vadd.f32 %v375_v38, %v274_v44 }
 0x18f   :  { %v2507_v48 = vpop.f32.mrf.mxu1 }
 0x190   :  { %v383_v49 = vadd.f32 %v381_v46, %v379_v47  ;;  %v279_v38 = vadd.f32 %v2507_v48, %v2504_v42  ;;  %v299_v48 = vld [vmem:[%s2844_s1 + $0x10] sm:$0xff] }
 0x191   :  { %v2164_v50 = vpop.f32.mrf.mxu1 }
 0x192   :  { %v2058_v51 = vmul.f32 -1.442695, %v383_v49 }
 0x193   :  { %v2510_v57 = vpop.f32.mrf.mxu1 }
 0x194   :  { %2264 = vpow2.f32 %v2058_v51 }
 0x195   :  { %v2167_v58 = vpop.f32.mrf.mxu1 }
 0x197   :  { %v2512_v59 = vpop.f32.mrf.mxu1 }
 0x199   :  { %v2170_v60 = vpop.f32.mrf.mxu1 }
 0x19b   :  { %v2514_v61 = vpop.f32.mrf.mxu1 }
 0x19d   :  { %v2173_v62 = vpop.f32.mrf.mxu1 }
 0x1a1   :  { %v2265_v52 = vpop.eup %2264 }
 0x1a2   :  { %v387_v53 = vadd.f32 1.0, %v2265_v52 }
 0x1a4   :  { %2266 = vrcp.f32 %v387_v53 }
 0x1b1   :  { %v2267_v55 = vpop.eup %2266 }
 0x1b2   :  { %v393_v56 = vmul.f32 %v2267_v55, %v391_v54  ;;  %v401_v19 = vsub.f32 1.0, %v2267_v55  ;;  %v400_v23 = vmul.f32 0.0, %v2267_v55 }
 0x1b4   :  { %395 = vrot.lane.b32.xlu1 %v393_v56, %s2346_s22 }
 0x226   :  { %v396_v63 = vpop.permute.xlu1 %395 }
 0x227   :  { %v398_v0 = vadd.f32 %v396_v63, %v379_v47 }
 0x229   :  { %2268 = vtanh.f32 %v398_v0 }
 0x236   :  { %v2269_v11 = vpop.eup %2268 }
 0x237   :  { %403 = vrot.lane.b32.xlu1 %v2269_v11, %s2347_s10 }
 0x23b   :  { %487 = vrot.lane.b32.xlu1 %v298_v16, %s2348_s14 }
 0x2a9   :  { %v404_v21 = vpop.permute.xlu1 %403 }
 0x2aa   :  { %v406_v24 = vmul.f32 %v404_v21, %v401_v19 }
 0x2ac   :  { %v407_v25 = vadd.f32 %v406_v24, %v400_v23 }
 0x2ad   :  { %v488_v33 = vpop.permute.xlu1 %487 }
 0x2ae   :  { %409 = vrot.lane.b32.xlu0 %v407_v25, %s2347_s10 }
 0x320   :  { %v410_v26 = vpop.permute.xlu0 %409 }
 0x321   :  { %2059 = vmatmul.mubr.msk.f32.vlgmr.msra.gmra.mxu0 %vm191_vm4, %v410_v26 }
 0x322   :  { %629 = vmatpush1.msra.mxu0 %v2524_v2  ;;  %668 = vmatprep.mubr.f32.mxu0 %v2342_v7 }
 0x323   :  { %630 = vmatprep.subr.mxu0 %v2529_v3 }
 0x324   :  { %631 = vmatpush1.msra.mxu0 %v2535_v4 }
 0x325   :  { %632 = vmatprep.subr.mxu0 %v2541_v5 }
 0x326   :  { %633 = vmatpush1.msra.mxu0 %v2547_v9 }
 0x327   :  { %634 = vmatprep.subr.mxu0 %v2553_v10 }
 0x328   :  { %635 = vmatpush1.msra.mxu0 %v2562_v15 }
 0x329   :  { %2189 = vmatprep.subr.mxu0 %v2342_v7 }
 0x3e1   :  { %v479_v27 = vpop.f32.mrf.mxu0 }
 0x3e2   :  { %v480_v28 = vadd.f32 %v479_v27, %v2462_v20 }
 0x3e3   :  { %v481_v29 = vpop.f32.mrf.mxu0 }
 0x3e4   :  { %v483_v31 = vmul.f32 0.5, %v480_v28  ;;  %571 = vrot.lane.b32.xlu1 %v480_v28, %s2344_s16 }
 0x3e6   :  { %v484_v32 = vmul.f32 1.442695, %v483_v31  ;;  %v284_v31 = vadd.f32 %v2510_v57, %v2504_v42  ;;  %v300_v57 = vld [vmem:[%s2844_s1 + $0x18] sm:$0xff] }
 0x3e8   :  { %2270 = vpow2.f32 %v484_v32 }
 0x3f5   :  { %v2271_v34 = vpop.eup %2270 }
 0x3f6   :  { %v490_v35 = vmul.f32 %v2271_v34, %v488_v33 }
 0x3f8   :  { %492 = vrot.lane.b32.xlu0 %v490_v35, %s2349_s2 }
 0x3fc   :  { %581 = vrot.lane.b32.xlu0 %v480_v28, %s2345_s17 }
 0x456   :  { %v572_v44 = vpop.permute.xlu1 %571 }
 0x46a   :  { %v493_v36 = vpop.permute.xlu0 %492 }
 0x46b   :  { %v495_v37 = vadd.f32 %v493_v36, %v480_v28 }
 0x46d   :  { %2182 = vmatmul.mubr.msk.f32.vlgmr.msra.gmra.mxu1 %vm305_vm2, %v495_v37 }
 0x46e   :  { %2185 = vmatpush3.msra.mxu1 %v2439_v14  ;;  %2186 = vmatprep.mubr.msk.f32.mxu1 %vm2343_vm3, %v2342_v7  ;;  %v582_v52 = vpop.permute.xlu0 %581 }
 0x46f   :  { %819 = vmatprep.subr.mxu1 %v2519_v1 }
 0x52d   :  { %v565_v39 = vpop.f32.mrf.mxu1 }
 0x52e   :  { %v569_v43 = vadd.f32 %v565_v39, %v279_v38 }
 0x52f   :  { %v2183_v45 = vpop.f32.mrf.mxu1 }
 0x530   :  { %v574_v46 = vadd.f32 %v572_v44, %v569_v43 }
 0x532   :  { %v2061_v47 = vmul.f32 -1.442695, %v574_v46 }
 0x534   :  { %2272 = vpow2.f32 %v2061_v47 }
 0x541   :  { %v2273_v49 = vpop.eup %2272 }
 0x542   :  { %v578_v50 = vadd.f32 1.0, %v2273_v49 }
 0x544   :  { %2274 = vrcp.f32 %v578_v50 }
 0x551   :  { %v2275_v51 = vpop.eup %2274 }
 0x552   :  { %v584_v53 = vmul.f32 %v2275_v51, %v582_v52  ;;  %v592_v58 = vsub.f32 1.0, %v2275_v51  ;;  %v591_v62 = vmul.f32 %v2275_v51, %v407_v25 }
 0x554   :  { %586 = vrot.lane.b32.xlu1 %v584_v53, %s2346_s22 }
 0x5c6   :  { %v587_v54 = vpop.permute.xlu1 %586 }
 0x5c7   :  { %v589_v55 = vadd.f32 %v587_v54, %v569_v43 }
 0x5c9   :  { %2276 = vtanh.f32 %v589_v55 }
 0x5d6   :  { %v2277_v56 = vpop.eup %2276 }
 0x5d7   :  { %594 = vrot.lane.b32.xlu0 %v2277_v56, %s2347_s10 }
 0x5db   :  { %678 = vrot.lane.b32.xlu0 %v299_v48, %s2348_s14 }
 0x649   :  { %v595_v60 = vpop.permute.xlu0 %594 }
 0x64a   :  { %v597_v63 = vmul.f32 %v595_v60, %v592_v58 }
 0x64c   :  { %v598_v0 = vadd.f32 %v597_v63, %v591_v62 }
 0x64d   :  { %v679_v25 = vpop.permute.xlu0 %678 }
 0x64e   :  { %600 = vrot.lane.b32.xlu1 %v598_v0, %s2347_s10 }
 0x6c0   :  { %v601_v11 = vpop.permute.xlu1 %600 }
 0x6c1   :  { %2062 = vmatmul.mubr.msk.f32.vlgmr.msra.gmra.mxu0 %vm191_vm4, %v601_v11 }
 0x6c2   :  { %2190 = vmatpush3.msra.mxu0 %v2439_v14  ;;  %2191 = vmatprep.mubr.msk.f32.mxu0 %vm2343_vm3, %v2342_v7 }
 0x6c3   :  { %1010 = vmatprep.subr.mxu0 %v2519_v1 }
 0x781   :  { %v670_v16 = vpop.f32.mrf.mxu0 }
 0x782   :  { %v671_v19 = vadd.f32 %v670_v16, %v2462_v20 }
 0x783   :  { %v672_v21 = vpop.f32.mrf.mxu0 }
 0x784   :  { %v674_v23 = vmul.f32 0.5, %v671_v19  ;;  %762 = vrot.lane.b32.xlu0 %v671_v19, %s2344_s16  ;;  %v289_v21 = vadd.f32 %v2512_v59, %v2504_v42  ;;  %v301_v59 = vld [vmem:[%s2844_s1 + $0x20] sm:$0xff] }
 0x786   :  { %v675_v24 = vmul.f32 1.442695, %v674_v23 }
 0x788   :  { %2278 = vpow2.f32 %v675_v24 }
 0x795   :  { %v2279_v26 = vpop.eup %2278 }
 0x796   :  { %v681_v27 = vmul.f32 %v2279_v26, %v679_v25 }
 0x798   :  { %683 = vrot.lane.b32.xlu1 %v681_v27, %s2349_s2 }
 0x79c   :  { %772 = vrot.lane.b32.xlu1 %v671_v19, %s2345_s17 }
 0x7f6   :  { %v763_v34 = vpop.permute.xlu0 %762 }
 0x80a   :  { %v684_v28 = vpop.permute.xlu1 %683 }
 0x80b   :  { %v686_v29 = vadd.f32 %v684_v28, %v671_v19 }
 0x80d   :  { %2187 = vmatmul.mubr.msk.f32.vlgmr.msra.gmra.mxu1 %vm305_vm2, %v686_v29 }
 0x80e   :  { %820 = vmatpush1.msra.mxu1 %v2524_v2  ;;  %859 = vmatprep.mubr.f32.mxu1 %v2342_v7  ;;  %v773_v44 = vpop.permute.xlu1 %772 }
 0x80f   :  { %821 = vmatprep.subr.mxu1 %v2529_v3 }
 0x810   :  { %822 = vmatpush1.msra.mxu1 %v2535_v4 }
 0x811   :  { %823 = vmatprep.subr.mxu1 %v2541_v5 }
 0x812   :  { %824 = vmatpush1.msra.mxu1 %v2547_v9 }
 0x813   :  { %825 = vmatprep.subr.mxu1 %v2553_v10 }
 0x814   :  { %826 = vmatpush1.msra.mxu1 %v2562_v15 }
 0x815   :  { %2194 = vmatprep.subr.mxu1 %v2342_v7 }
 0x8cd   :  { %v756_v32 = vpop.f32.mrf.mxu1 }
 0x8ce   :  { %v760_v33 = vadd.f32 %v756_v32, %v284_v31 }
 0x8cf   :  { %v2188_v35 = vpop.f32.mrf.mxu1 }
 0x8d0   :  { %v765_v36 = vadd.f32 %v763_v34, %v760_v33 }
 0x8d2   :  { %v2064_v37 = vmul.f32 -1.442695, %v765_v36 }
 0x8d4   :  { %2280 = vpow2.f32 %v2064_v37 }
 0x8e1   :  { %v2281_v38 = vpop.eup %2280 }
 0x8e2   :  { %v769_v39 = vadd.f32 1.0, %v2281_v38 }
 0x8e4   :  { %2282 = vrcp.f32 %v769_v39 }
 0x8f1   :  { %v2283_v43 = vpop.eup %2282 }
 0x8f2   :  { %v775_v45 = vmul.f32 %v2283_v43, %v773_v44  ;;  %v783_v50 = vsub.f32 1.0, %v2283_v43  ;;  %v782_v52 = vmul.f32 %v2283_v43, %v598_v0 }
 0x8f4   :  { %777 = vrot.lane.b32.xlu0 %v775_v45, %s2346_s22 }
 0x966   :  { %v778_v46 = vpop.permute.xlu0 %777 }
 0x967   :  { %v780_v47 = vadd.f32 %v778_v46, %v760_v33 }
 0x969   :  { %2284 = vtanh.f32 %v780_v47 }
 0x976   :  { %v2285_v49 = vpop.eup %2284 }
 0x977   :  { %785 = vrot.lane.b32.xlu1 %v2285_v49, %s2347_s10 }
 0x97b   :  { %869 = vrot.lane.b32.xlu1 %v300_v57, %s2348_s14 }
 0x9e9   :  { %v786_v51 = vpop.permute.xlu1 %785 }
 0x9ea   :  { %v788_v53 = vmul.f32 %v786_v51, %v783_v50 }
 0x9ec   :  { %v789_v54 = vadd.f32 %v788_v53, %v782_v52 }
 0x9ed   :  { %v870_v63 = vpop.permute.xlu1 %869 }
 0x9ee   :  { %791 = vrot.lane.b32.xlu0 %v789_v54, %s2347_s10 }
 0xa60   :  { %v792_v55 = vpop.permute.xlu0 %791 }
 0xa61   :  { %2065 = vmatmul.mubr.msk.f32.vlgmr.msra.gmra.mxu1 %vm191_vm4, %v792_v55 }
 0xa62   :  { %2195 = vmatpush3.msra.mxu1 %v2439_v14  ;;  %2196 = vmatprep.mubr.msk.f32.mxu1 %vm2343_vm3, %v2342_v7 }
 0xa63   :  { %1201 = vmatprep.subr.mxu1 %v2519_v1 }
 0xb21   :  { %v861_v56 = vpop.f32.mrf.mxu1 }
 0xb22   :  { %v862_v48 = vadd.f32 %v861_v56, %v2462_v20 }
 0xb23   :  { %v863_v58 = vpop.f32.mrf.mxu1 }
 0xb24   :  { %v865_v60 = vmul.f32 0.5, %v862_v48  ;;  %953 = vrot.lane.b32.xlu1 %v862_v48, %s2344_s16 }
 0xb26   :  { %v866_v62 = vmul.f32 1.442695, %v865_v60 }
 0xb28   :  { %2286 = vpow2.f32 %v866_v62 }
 0xb35   :  { %v2287_v0 = vpop.eup %2286 }
 0xb36   :  { %v872_v11 = vmul.f32 %v2287_v0, %v870_v63 }
 0xb38   :  { %874 = vrot.lane.b32.xlu0 %v872_v11, %s2349_s2 }
 0xb3c   :  { %963 = vrot.lane.b32.xlu0 %v862_v48, %s2345_s17 }
 0xb96   :  { %v954_v25 = vpop.permute.xlu1 %953 }
 0xbaa   :  { %v875_v16 = vpop.permute.xlu0 %874 }
 0xbab   :  { %v877_v19 = vadd.f32 %v875_v16, %v862_v48  ;;  %v294_v48 = vadd.f32 %v2514_v61, %v2504_v42  ;;  %v302_v61 = vld [vmem:[%s2844_s1 + $0x28] sm:$0xff] }
 0xbad   :  { %2192 = vmatmul.mubr.msk.f32.vlgmr.msra.gmra.mxu0 %vm305_vm2, %v877_v19 }
 0xbae   :  { %1011 = vmatpush1.msra.mxu0 %v2524_v2  ;;  %1050 = vmatprep.mubr.f32.mxu0 %v2342_v7  ;;  %v964_v33 = vpop.permute.xlu0 %963 }
 0xbaf   :  { %1012 = vmatprep.subr.mxu0 %v2529_v3 }
 0xbb0   :  { %1013 = vmatpush1.msra.mxu0 %v2535_v4 }
 0xbb1   :  { %1014 = vmatprep.subr.mxu0 %v2541_v5 }
 0xbb2   :  { %1015 = vmatpush1.msra.mxu0 %v2547_v9 }
 0xbb3   :  { %1016 = vmatprep.subr.mxu0 %v2553_v10 }
 0xbb4   :  { %1017 = vmatpush1.msra.mxu0 %v2562_v15 }
 0xbb5   :  { %2199 = vmatprep.subr.mxu0 %v2342_v7 }
 0xc6d   :  { %v947_v23 = vpop.f32.mrf.mxu0 }
 0xc6e   :  { %v951_v24 = vadd.f32 %v947_v23, %v289_v21 }
 0xc6f   :  { %v2193_v26 = vpop.f32.mrf.mxu0 }
 0xc70   :  { %v956_v27 = vadd.f32 %v954_v25, %v951_v24 }
 0xc72   :  { %v2067_v28 = vmul.f32 -1.442695, %v956_v27 }
 0xc74   :  { %2288 = vpow2.f32 %v2067_v28 }
 0xc81   :  { %v2289_v29 = vpop.eup %2288 }
 0xc82   :  { %v960_v31 = vadd.f32 1.0, %v2289_v29 }
 0xc84   :  { %2290 = vrcp.f32 %v960_v31 }
 0xc91   :  { %v2291_v32 = vpop.eup %2290 }
 0xc92   :  { %v966_v34 = vmul.f32 %v2291_v32, %v964_v33  ;;  %v974_v38 = vsub.f32 1.0, %v2291_v32  ;;  %v973_v43 = vmul.f32 %v2291_v32, %v789_v54 }
 0xc94   :  { %968 = vrot.lane.b32.xlu1 %v966_v34, %s2346_s22 }
 0xd06   :  { %v969_v35 = vpop.permute.xlu1 %968 }
 0xd07   :  { %v971_v36 = vadd.f32 %v969_v35, %v951_v24 }
 0xd09   :  { %2292 = vtanh.f32 %v971_v36 }
 0xd16   :  { %v2293_v37 = vpop.eup %2292 }
 0xd17   :  { %976 = vrot.lane.b32.xlu0 %v2293_v37, %s2347_s10 }
 0xd1b   :  { %1060 = vrot.lane.b32.xlu0 %v301_v59, %s2348_s14 }
 0xd89   :  { %v977_v39 = vpop.permute.xlu0 %976 }
 0xd8a   :  { %v979_v44 = vmul.f32 %v977_v39, %v974_v38 }
 0xd8c   :  { %v980_v45 = vadd.f32 %v979_v44, %v973_v43 }
 0xd8d   :  { %v1061_v52 = vpop.permute.xlu0 %1060 }
 0xd8e   :  { %982 = vrot.lane.b32.xlu1 %v980_v45, %s2347_s10 }
 0xe00   :  { %v983_v46 = vpop.permute.xlu1 %982 }
 0xe01   :  { %2068 = vmatmul.mubr.msk.f32.vlgmr.msra.gmra.mxu0 %vm191_vm4, %v983_v46 }
 0xe02   :  { %2200 = vmatpush3.msra.mxu0 %v2439_v14  ;;  %2201 = vmatprep.mubr.msk.f32.mxu0 %vm2343_vm3, %v2342_v7 }
 0xe03   :  { %2204 = vmatprep.subr.mxu0 %v2342_v7 }
 0xec1   :  { %v1052_v47 = vpop.f32.mrf.mxu0 }
 0xec2   :  { %v1053_v49 = vadd.f32 %v1052_v47, %v2462_v20 }
 0xec3   :  { %v1054_v57 = vpop.f32.mrf.mxu0 }
 0xec4   :  { %v1056_v50 = vmul.f32 0.5, %v1053_v49  ;;  %1144 = vrot.lane.b32.xlu0 %v1053_v49, %s2344_s16 }
 0xec6   :  { %v1057_v51 = vmul.f32 1.442695, %v1056_v50 }
 0xec8   :  { %2294 = vpow2.f32 %v1057_v51 }
 0xed5   :  { %v2295_v53 = vpop.eup %2294 }
 0xed6   :  { %v1063_v54 = vmul.f32 %v2295_v53, %v1061_v52 }
 0xed8   :  { %1065 = vrot.lane.b32.xlu1 %v1063_v54, %s2349_s2 }
 0xedc   :  { %1154 = vrot.lane.b32.xlu1 %v1053_v49, %s2345_s17 }
 0xf36   :  { %v1145_v62 = vpop.permute.xlu0 %1144 }
 0xf4a   :  { %v1066_v55 = vpop.permute.xlu1 %1065 }
 0xf4b   :  { %v1068_v56 = vadd.f32 %v1066_v55, %v1053_v49  ;;  %v40_v49 = vsub.s32 1, %v2453_v17 }
 0xf4d   :  { %2197 = vmatmul.mubr.msk.f32.vlgmr.msra.gmra.mxu1 %vm305_vm2, %v1068_v56  ;;  %v2712_v57 = vrot.slane %v2458_v18, %v40_v49 }
 0xf4e   :  { %1202 = vmatpush1.msra.mxu1 %v2524_v2  ;;  %1241 = vmatprep.mubr.f32.mxu1 %v2342_v7  ;;  %v1155_v23 = vpop.permute.xlu1 %1154 }
 0xf4f   :  { %1203 = vmatprep.subr.mxu1 %v2529_v3 }
 0xf50   :  { %1204 = vmatpush1.msra.mxu1 %v2535_v4 }
 0xf51   :  { %1205 = vmatprep.subr.mxu1 %v2541_v5 }
 0xf52   :  { %1206 = vmatpush1.msra.mxu1 %v2547_v9 }
 0xf53   :  { %1207 = vmatprep.subr.mxu1 %v2553_v10 }
 0xf54   :  { %1208 = vmatpush1.msra.mxu1 %v2562_v15 }
 0xf55   :  { %1479 = vmatprep.subr.mxu1 %v2519_v1 }
0x100d   :  { %v1138_v58 = vpop.f32.mrf.mxu1 }
0x100e   :  { %v1142_v60 = vadd.f32 %v1138_v58, %v294_v48 }
0x100f   :  { %v2198_v63 = vpop.f32.mrf.mxu1 }
0x1010   :  { %v1147_v0 = vadd.f32 %v1145_v62, %v1142_v60 }
0x1012   :  { %v2070_v11 = vmul.f32 -1.442695, %v1147_v0 }
0x1014   :  { %2296 = vpow2.f32 %v2070_v11 }
0x1021   :  { %v2297_v16 = vpop.eup %2296 }
0x1022   :  { %v1151_v19 = vadd.f32 1.0, %v2297_v16 }
0x1024   :  { %2298 = vrcp.f32 %v1151_v19 }
0x1031   :  { %v2299_v21 = vpop.eup %2298 }
0x1032   :  { %v1157_v24 = vmul.f32 %v2299_v21, %v1155_v23  ;;  %v1165_v28 = vsub.f32 1.0, %v2299_v21  ;;  %v1164_v31 = vmul.f32 %v2299_v21, %v980_v45 }
0x1034   :  { %1159 = vrot.lane.b32.xlu0 %v1157_v24, %s2346_s22 }
0x10a6   :  { %v1160_v25 = vpop.permute.xlu0 %1159 }
0x10a7   :  { %v1162_v26 = vadd.f32 %v1160_v25, %v1142_v60 }
0x10a9   :  { %2300 = vtanh.f32 %v1162_v26  ;;  %v303_v26 = vld [vmem:[%s2844_s1 + $0x30] sm:$0xff] }
0x10b6   :  { %v2301_v27 = vpop.eup %2300 }
0x10b7   :  { %1167 = vrot.lane.b32.xlu1 %v2301_v27, %s2347_s10 }
0x10bb   :  { %1252 = vrot.lane.b32.xlu1 %v302_v61, %s2348_s14 }
0x1129   :  { %v1168_v29 = vpop.permute.xlu1 %1167 }
0x112a   :  { %v1170_v32 = vmul.f32 %v1168_v29, %v1165_v28 }
0x112c   :  { %v2682_v33 = vadd.f32 %v1170_v32, %v1164_v31 }
0x112d   :  { %v1253_v38 = vpop.permute.xlu1 %1252 }
0x112e   :  { %1173 = vrot.lane.b32.xlu0 %v2682_v33, %s2347_s10 }
0x11a0   :  { %v1174_v34 = vpop.permute.xlu0 %1173 }
0x11a1   :  { %2071 = vmatmul.mubr.msk.f32.vlgmr.msra.gmra.mxu1 %vm191_vm4, %v1174_v34 }
0x11a2   :  { %1480 = vmatpush1.msra.mxu1 %v2524_v2  ;;  %1519 = vmatprep.mubr.f32.mxu1 %v2342_v7 }
0x11a3   :  { %1481 = vmatprep.subr.mxu1 %v2529_v3 }
0x11a4   :  { %1482 = vmatpush1.msra.mxu1 %v2535_v4 }
0x11a5   :  { %1483 = vmatprep.subr.mxu1 %v2541_v5 }
0x11a6   :  { %1484 = vmatpush1.msra.mxu1 %v2547_v9 }
0x11a7   :  { %1485 = vmatprep.subr.mxu1 %v2553_v10 }
0x11a8   :  { %1486 = vmatpush1.msra.mxu1 %v2562_v15 }
0x11a9   :  { %2220 = vmatprep.subr.mxu1 %v2342_v7 }
0x1261   :  { %v1243_v35 = vpop.f32.mrf.mxu1 }
0x1262   :  { %v1244_v36 = vadd.f32 %v1243_v35, %v2462_v20 }
0x1263   :  { %v1245_v50 = vpop.f32.mrf.mxu1 }
0x1264   :  { %v1248_v37 = vmul.f32 0.5, %v1244_v36  ;;  %v1246_v51 = vadd.f32 %v1245_v50, %v2712_v57 }
0x1266   :  { %v1249_v59 = vmul.f32 1.442695, %v1248_v37 }
0x1268   :  { %2302 = vpow2.f32 %v1249_v59 }
0x1275   :  { %v2303_v39 = vpop.eup %2302 }
0x1276   :  { %v1255_v43 = vmul.f32 %v2303_v39, %v1253_v38 }
0x1278   :  { %1257 = vrot.lane.b32.xlu0 %v1255_v43, %s2349_s2 }
0x12ea   :  { %v1258_v44 = vpop.permute.xlu0 %1257 }
0x12eb   :  { %v1260_v45 = vadd.f32 %v1258_v44, %v1244_v36 }
0x12ed   :  { %2202 = vmatmul.mubr.msk.f32.vlgmr.msra.gmra.mxu0 %vm305_vm2, %v1260_v45 }
0x12ee   :  { %2205 = vmatpush3.msra.mxu0 %v2396_v6  ;;  %2212 = vmatprep.mubr.msk.f32.mxu0 %vm2343_vm3, %v2342_v7 }
0x12ef   :  { %2206 = vmatprep.subr.mxu0 %v2342_v7 }
0x12f0   :  { %2207 = vmatpush3.msra.mxu0 %v2404_v8 }
0x12f1   :  { %2208 = vmatprep.subr.mxu0 %v2342_v7 }
0x12f2   :  { %2209 = vmatpush3.msra.mxu0 %v2427_v12 }
0x12f3   :  { %2210 = vmatprep.subr.mxu0 %v2342_v7 }
0x12f4   :  { %2211 = vmatpush3.msra.mxu0 %v2434_v13 }
0x12f5   :  { %2215 = vmatprep.subr.mxu0 %v2342_v7 }
0x13ad   :  { %v1330_v46 = vpop.f32.mrf.mxu0 }
0x13ae   :  { %1335 = vrot.lane.b32.xlu1 %v1330_v46, %s2350_s26 }
0x13af   :  { %v2203_v47 = vpop.f32.mrf.mxu0 }
0x1420   :  { %v1336_v52 = vpop.permute.xlu1 %1335 }
0x1421   :  { %v2715_v53 = vadd.f32 %v1336_v52, %v1244_v36  ;;  %v2717_v54 = vadd.f32 %v1336_v52, %v1246_v51 }
0x1423   :  { %1344 = vrot.lane.b32.xlu1 %v2717_v54, %s2350_s26  ;;  %1342 = vrot.lane.b32.xlu0 %v2715_v53, %s2350_s26 }
0x1427   :  { %1432 = vrot.lane.b32.xlu1 %v1244_v36, %s2345_s17  ;;  %1422 = vrot.lane.b32.xlu0 %v1244_v36, %s2344_s16 }
0x1495   :  { %v1345_v17 = vpop.permute.xlu1 %1344  ;;  %v1343_v18 = vpop.permute.xlu0 %1342 }
0x1496   :  { %v1347_v55 = vsel %vm1346_vm5, %v1343_v18, %v1345_v17 }
0x1497   :  { %2213 = vmatmul.mubr.msk.f32.vlgmr.msra.gmra.mxu0 %vm191_vm4, %v1347_v55 }
0x1498   :  { %2216 = vmatpush3.msra.mxu0 %v2439_v14  ;;  %2217 = vmatprep.mubr.msk.f32.mxu0 %vm2343_vm3, %v2342_v7 }
0x1499   :  { %1756 = vmatprep.subr.mxu0 %v2519_v1  ;;  %v1423_v62 = vpop.permute.xlu0 %1422  ;;  %v1433_v21 = vpop.permute.xlu1 %1432 }
0x1557   :  { %v1416_v56 = vpop.f32.mrf.mxu0 }
0x1558   :  { %v1417_v48 = vadd.f32 %v1416_v56, %v2504_v42 }
0x1559   :  { %v2214_v58 = vpop.f32.mrf.mxu0 }
0x155a   :  { %v1420_v60 = vadd.f32 %v1417_v48, %v1330_v46 }
0x155c   :  { %v1425_v63 = vadd.f32 %v1423_v62, %v1420_v60 }
0x155e   :  { %v2074_v0 = vmul.f32 -1.442695, %v1425_v63  ;;  %v304_v63 = vld [vmem:[%s2844_s1 + $0x38] sm:$0xff]  ;;  %s2351_s1 = smov [#allocation2]  }
0x1560   :  { %2304 = vpow2.f32 %v2074_v0 }
0x156d   :  { %v2305_v11 = vpop.eup %2304 }
0x156e   :  { %v1429_v16 = vadd.f32 1.0, %v2305_v11  ;;  %v183_v11 = vadd.f32 %v2497_v40, %v2471_v22  ;;  %v173_v40 = vadd.f32 %v2479_v30, %v2471_v22 }
0x1570   :  { %2306 = vrcp.f32 %v1429_v16 }
0x157d   :  { %v2307_v19 = vpop.eup %2306 }
0x157e   :  { %v1435_v23 = vmul.f32 %v2307_v19, %v1433_v21  ;;  %v1443_v27 = vsub.f32 1.0, %v2307_v19  ;;  %v1442_v28 = vmul.f32 %v2307_v19, %v2682_v33  ;;  %v178_v19 = vadd.f32 %v2499_v41, %v2471_v22 }
0x1580   :  { %1437 = vrot.lane.b32.xlu0 %v1435_v23, %s2346_s22 }
0x15f2   :  { %v1438_v24 = vpop.permute.xlu0 %1437 }
0x15f3   :  { %v1440_v25 = vadd.f32 %v1438_v24, %v1420_v60 }
0x15f5   :  { %2308 = vtanh.f32 %v1440_v25 }
0x1602   :  { %v2309_v1 = vpop.eup %2308 }
0x1603   :  { %1445 = vrot.lane.b32.xlu1 %v2309_v1, %s2347_s10 }
0x1607   :  { %1530 = vrot.lane.b32.xlu1 %v303_v26, %s2348_s14 }
0x1675   :  { %v1446_v61 = vpop.permute.xlu1 %1445 }
0x1676   :  { %v1448_v29 = vmul.f32 %v1446_v61, %v1443_v27 }
0x1678   :  { %v2739_v31 = vadd.f32 %v1448_v29, %v1442_v28 }
0x1679   :  { %v1531_v36 = vpop.permute.xlu1 %1530 }
0x167a   :  { %1451 = vrot.lane.b32.xlu0 %v2739_v31, %s2347_s10 }
0x16ec   :  { %v1452_v32 = vpop.permute.xlu0 %1451 }
0x16ed   :  { %2075 = vmatmul.mubr.msk.f32.vlgmr.msra.gmra.mxu1 %vm191_vm4, %v1452_v32 }
0x16ee   :  { %2221 = vmatpush3.msra.mxu1 %v2396_v6  ;;  %2228 = vmatprep.mubr.msk.f32.mxu1 %vm2343_vm3, %v2342_v7 }
0x16ef   :  { %2222 = vmatprep.subr.mxu1 %v2342_v7 }
0x16f0   :  { %2223 = vmatpush3.msra.mxu1 %v2404_v8 }
0x16f1   :  { %2224 = vmatprep.subr.mxu1 %v2342_v7 }
0x16f2   :  { %2225 = vmatpush3.msra.mxu1 %v2427_v12 }
0x16f3   :  { %2226 = vmatprep.subr.mxu1 %v2342_v7 }
0x16f4   :  { %2227 = vmatpush3.msra.mxu1 %v2434_v13 }
0x16f5   :  { %2231 = vmatprep.subr.mxu1 %v2342_v7 }
0x17ad   :  { %v1521_v33 = vpop.f32.mrf.mxu1 }
0x17ae   :  { %v1522_v6 = vadd.f32 %v1521_v33, %v2462_v20 }
0x17b0   :  { %v1526_v34 = vmul.f32 0.5, %v1522_v6 }
0x17b2   :  { %v1527_v35 = vmul.f32 1.442695, %v1526_v34 }
0x17b4   :  { %2310 = vpow2.f32 %v1527_v35 }
0x17c1   :  { %v2311_v37 = vpop.eup %2310 }
0x17c2   :  { %v1533_v59 = vmul.f32 %v2311_v37, %v1531_v36 }
0x17c4   :  { %1535 = vrot.lane.b32.xlu0 %v1533_v59, %s2349_s2 }
0x1836   :  { %v1536_v8 = vpop.permute.xlu0 %1535 }
0x1837   :  { %v1538_v38 = vadd.f32 %v1536_v8, %v1522_v6 }
0x1839   :  { %2218 = vmatmul.mubr.msk.f32.vlgmr.msra.gmra.mxu0 %vm305_vm2, %v1538_v38 }
0x183a   :  { %1757 = vmatpush1.msra.mxu0 %v2524_v2  ;;  %1796 = vmatprep.mubr.f32.mxu0 %v2342_v7  ;;  %v1523_v2 = vpop.f32.mrf.mxu1 }
0x183b   :  { %1758 = vmatprep.subr.mxu0 %v2529_v3  ;;  %v1524_v39 = vadd.f32 %v1523_v2, %v2712_v57 }
0x183c   :  { %1759 = vmatpush1.msra.mxu0 %v2535_v4 }
0x183d   :  { %1760 = vmatprep.subr.mxu0 %v2541_v5 }
0x183e   :  { %1761 = vmatpush1.msra.mxu0 %v2547_v9 }
0x183f   :  { %1762 = vmatprep.subr.mxu0 %v2553_v10 }
0x1840   :  { %1763 = vmatpush1.msra.mxu0 %v2562_v15 }
0x1841   :  { %2236 = vmatprep.subr.mxu0 %v2342_v7 }
0x18f9   :  { %v1608_v12 = vpop.f32.mrf.mxu0 }
0x18fa   :  { %1613 = vrot.lane.b32.xlu1 %v1608_v12, %s2350_s26 }
0x18fb   :  { %v2219_v13 = vpop.f32.mrf.mxu0 }
0x196c   :  { %v1614_v3 = vpop.permute.xlu1 %1613 }
0x196d   :  { %v2768_v43 = vadd.f32 %v1614_v3, %v1522_v6  ;;  %v2770_v4 = vadd.f32 %v1614_v3, %v1524_v39 }
0x196f   :  { %1622 = vrot.lane.b32.xlu1 %v2770_v4, %s2350_s26  ;;  %1620 = vrot.lane.b32.xlu0 %v2768_v43, %s2350_s26  ;;  %v1895_v41 = vrot.slane %v2768_v43, 4 }
0x1971   :  { %v1900_v61 = vsel %vm1899_vm6, %v2715_v53, %v1895_v41 }
0x1973   :  { %1709 = vrot.lane.b32.xlu1 %v1522_v6, %s2345_s17  ;;  %1699 = vrot.lane.b32.xlu0 %v1522_v6, %s2344_s16 }
0x19e1   :  { %v1623_v5 = vpop.permute.xlu1 %1622  ;;  %v1621_v9 = vpop.permute.xlu0 %1620 }
0x19e2   :  { %v1624_v10 = vsel %vm1346_vm5, %v1621_v9, %v1623_v5 }
0x19e3   :  { %2229 = vmatmul.mubr.msk.f32.vlgmr.msra.gmra.mxu1 %vm191_vm4, %v1624_v10 }
0x19e4   :  { %2232 = vmatpush3.msra.mxu1 %v2439_v14  ;;  %2233 = vmatprep.mubr.msk.f32.mxu1 %vm2343_vm3, %v2342_v7 }
0x19e5   :  { %v1700_v47 = vpop.permute.xlu0 %1699  ;;  %v1710_v18 = vpop.permute.xlu1 %1709 }
0x1aa3   :  { %v1693_v15 = vpop.f32.mrf.mxu1 }
0x1aa4   :  { %v1694_v44 = vadd.f32 %v1693_v15, %v2504_v42 }
0x1aa5   :  { %v2230_v45 = vpop.f32.mrf.mxu1 }
0x1aa6   :  { %v1697_v46 = vadd.f32 %v1694_v44, %v1608_v12 }
0x1aa8   :  { %v1702_v49 = vadd.f32 %v1700_v47, %v1697_v46 }
0x1aaa   :  { %v2078_v50 = vmul.f32 -1.442695, %v1702_v49 }
0x1aac   :  { %2312 = vpow2.f32 %v2078_v50 }
0x1ab9   :  { %v2313_v51 = vpop.eup %2312 }
0x1aba   :  { %v1706_v52 = vadd.f32 1.0, %v2313_v51 }
0x1abc   :  { %2314 = vrcp.f32 %v1706_v52 }
0x1ac9   :  { %v2315_v17 = vpop.eup %2314 }
0x1aca   :  { %v1712_v55 = vmul.f32 %v2315_v17, %v1710_v18  ;;  %v1720_v42 = vsub.f32 1.0, %v2315_v17  ;;  %v1719_v60 = vmul.f32 %v2315_v17, %v2739_v31 }
0x1acc   :  { %1714 = vrot.lane.b32.xlu0 %v1712_v55, %s2346_s22  ;;  %s2031_s22 = sshll.u32 %s2351_s1, 4  ;;  %s2032_s22 = int_to_ptr.vmem [resolvable:$true] %s2031_s22 }
0x1acd   :  { %s2320_s29 = scalar_lea.vmem %s2032_s22, 384  ;;  %p2325_p1 = scmp.lt.s32.totalorder %s2032_s22, %s2032_s22 }
0x1ace   :  { %p2321_p0 = scmp.ne.s32.totalorder %s2032_s22, %s2320_s29  ;;  %p2326_p2 = scmp.lt.s32.totalorder %s2320_s29, %s2320_s29 }
0x1ad0   :  { %p2327_p3 = por %p2326_p2, %p2325_p1 }
0x1ad2   :  { %p2328_p4 = pnand %p2327_p3, %p2321_p0 }
0x1b3e   :  { %v1715_v14 = vpop.permute.xlu0 %1714 }
0x1b3f   :  { %v1717_v56 = vadd.f32 %v1715_v14, %v1697_v46 }
0x1b41   :  { %2316 = vtanh.f32 %v1717_v56 }
0x1b4e   :  { %v2317_v48 = vpop.eup %2316 }
0x1b4f   :  { %1722 = vrot.lane.b32.xlu1 %v2317_v48, %s2347_s10 }
0x1b53   :  { %1807 = vrot.lane.b32.xlu1 %v304_v63, %s2348_s14 }
0x1bc1   :  { %v1723_v58 = vpop.permute.xlu1 %1722 }
0x1bc2   :  { %v1725_v62 = vmul.f32 %v1723_v58, %v1720_v42 }
0x1bc4   :  { %v1726_v0 = vadd.f32 %v1725_v62, %v1719_v60 }
0x1bc5   :  { %v1808_v1 = vpop.permute.xlu1 %1807 }
0x1bc6   :  { %1728 = vrot.lane.b32.xlu0 %v1726_v0, %s2347_s10 }
0x1c38   :  { %v1729_v16 = vpop.permute.xlu0 %1728 }
0x1c39   :  { %2079 = vmatmul.mubr.msk.f32.vlgmr.msra.gmra.mxu0 %vm191_vm4, %v1729_v16 }
0x1c3a   :  { %2237 = vmatpush3.xpose.msk.msra.mxu0 %vm191_vm4, %v183_v11  ;;  %2242 = vmatprep.mubr.msk.f32.mxu0 %vm2343_vm3, %v2342_v7 }
0x1c3b   :  { %2238 = vmatprep.subr.mxu0 %v2342_v7 }
0x1c3e   :  { %2239 = vmatpush3.xpose.msk.msra.mxu0 %vm191_vm4, %v178_v19 }
0x1c3f   :  { %2240 = vmatprep.subr.mxu0 %v2342_v7 }
0x1c42   :  { %2241 = vmatpush3.xpose.msk.msra.mxu0 %vm191_vm4, %v173_v40 }
0x1cf9   :  { %v1798_v21 = vpop.f32.mrf.mxu0 }
0x1cfa   :  { %v1799_v23 = vadd.f32 %v1798_v21, %v2462_v20  ;;  %v1896_v20 = vrot.slane %v2770_v4, 4 }
0x1cfb   :  { %v1800_v32 = vpop.f32.mrf.mxu0 }
0x1cfc   :  { %v1803_v24 = vmul.f32 0.5, %v1799_v23  ;;  %v1901_v31 = vsel %vm1899_vm6, %v2717_v54, %v1896_v20  ;;  %v1801_v33 = vadd.f32 %v1800_v32, %v2712_v57 }
0x1cfe   :  { %v1804_v25 = vmul.f32 1.442695, %v1803_v24 }
0x1d00   :  { %2318 = vpow2.f32 %v1804_v25 }
0x1d0d   :  { %v2319_v26 = vpop.eup %2318 }
0x1d0e   :  { %v1810_v27 = vmul.f32 %v2319_v26, %v1808_v1 }
0x1d10   :  { %1812 = vrot.lane.b32.xlu0 %v1810_v27, %s2349_s2 }
0x1d14   :  { %1912 = vrot.lane.b32.xlu0 %v1900_v61, %s2350_s26 }
0x1d82   :  { %v1813_v22 = vpop.permute.xlu0 %1812 }
0x1d83   :  { %v1815_v30 = vadd.f32 %v1813_v22, %v1799_v23 }
0x1d85   :  { %2234 = vmatmul.mubr.msk.f32.vlgmr.msra.gmra.mxu1 %vm305_vm2, %v1815_v30 }
0x1d86   :  { %v1913_v59 = vpop.permute.xlu0 %1912 }
0x1e45   :  { %v1885_v28 = vpop.f32.mrf.mxu1 }
0x1e46   :  { %1890 = vrot.lane.b32.xlu1 %v1885_v28, %s2350_s26 }
0x1e47   :  { %v2235_v29 = vpop.f32.mrf.mxu1 }
0x1e4a   :  { %1914 = vrot.lane.b32.xlu1 %v1901_v31, %s2350_s26 }
0x1eb8   :  { %v1891_v6 = vpop.permute.xlu1 %1890 }
0x1eb9   :  { %v1893_v34 = vadd.f32 %v1891_v6, %v1799_v23  ;;  %v1894_v35 = vadd.f32 %v1891_v6, %v1801_v33 }
0x1ebb   :  { %v1903_v36 = vsel %vm1899_vm6, %v1894_v35, %v2717_v54  ;;  %v1902_v37 = vsel %vm1899_vm6, %v1893_v34, %v2715_v53  ;;  %v1905_v57 = vsel %vm1899_vm6, %v1896_v20, %v1894_v35  ;;  %v1904_v12 = vsel %vm1899_vm6, %v1895_v41, %v1893_v34 }
0x1ebc   :  { %1918 = vrot.lane.b32.xlu1 %v1903_v36, %s2350_s26  ;;  %1916 = vrot.lane.b32.xlu0 %v1902_v37, %s2350_s26  ;;  %v1915_v8 = vpop.permute.xlu1 %1914 }
0x1ebd   :  { %v1924_v38 = vsel %vm1346_vm5, %v1913_v59, %v1915_v8 }
0x1ebe   :  { %2243 = vmatmul.mubr.msk.f32.vlgmr.msra.gmra.mxu0 %vm191_vm4, %v1924_v38 }
0x1ebf   :  { %2245 = vmatprep.mubr.msk.f32.mxu0 %vm2343_vm3, %v2342_v7 }
0x1ec0   :  { %1922 = vrot.lane.b32.xlu1 %v1905_v57, %s2350_s26  ;;  %1920 = vrot.lane.b32.xlu0 %v1904_v12, %s2350_s26 }
0x1f2e   :  { %v1919_v53 = vpop.permute.xlu1 %1918  ;;  %v1917_v54 = vpop.permute.xlu0 %1916 }
0x1f2f   :  { %v1925_v13 = vsel %vm1346_vm5, %v1917_v54, %v1919_v53 }
0x1f30   :  { %2246 = vmatmul.mubr.msk.f32.gmra.mxu0 %vm191_vm4, %v1925_v13 }
0x1f31   :  { %2248 = vmatprep.mubr.msk.f32.mxu0 %vm2343_vm3, %v2342_v7 }
0x1f32   :  { %v1923_v2 = vpop.permute.xlu1 %1922  ;;  %v1921_v39 = vpop.permute.xlu0 %1920 }
0x1f33   :  { %v1926_v3 = vsel %vm1346_vm5, %v1921_v39, %v1923_v2 }
0x1f34   :  { %2249 = vmatmul.mubr.msk.f32.gmra.mxu0 %vm191_vm4, %v1926_v3 }
0x1f7e   :  { %v2008_v43 = vpop.f32.mrf.mxu0 }
0x1f7f   :  { %2023 = vst.msk [vmem:[#allocation2] sm:$0xff] %vm2022_vm7, %v2008_v43 }
0x1f80   :  { %v2244_v4 = vpop.f32.mrf.mxu0 }
0x1ff0   :  { %v2013_v5 = vpop.f32.mrf.mxu0 }
0x1ff1   :  { %2024 = vst.msk [vmem:[#allocation2 + $0x8] sm:$0xff] %vm2022_vm7, %v2013_v5 }
0x1ff2   :  { %v2247_v9 = vpop.f32.mrf.mxu0 }
0x1ff4   :  { %v2018_v10 = vpop.f32.mrf.mxu0 }
0x1ff5   :  { %2025 = vst.msk [vmem:[#allocation2 + $0x10] sm:$0xff] %vm2022_vm7, %v2018_v10 }
0x1ff6   :  { %v2250_v15 = vpop.f32.mrf.mxu0 }
0x1ff7   :  { %2331 = shalt.err (!%p2328_p4)
}
0x1ff8   :  { %s2352_s30 = smov 128  }
0x1ff9   :  { %2037 = dma.vmem_to_hbm [thread:$0]  %s2032_s22, 384, %s2846_s3, [#allocation3], %s2352_s30, %s2352_s30, %s2348_s14  }
0x1ffa   :  { %2340 = dma.done.wait [#allocation3], 384  }
0x1ffb   :  { %2341 = vsyncadd [#allocation3], 4294966912 }
0x1ffc   :  { %2041 = vsyncpa [#allocation3], 1 }

</bundles_post_ra>
